<compile_context>
chip_gen: v7x
topology: tpu7x:2x2x1
jax: 0.10.0
libtpu: 0.0.40
codegen_flags: <defaults>
</compile_context>

<pallas_src>
import math
import jax
import jax.numpy as jnp
from jax import lax
from jax.experimental import pallas as pl
from jax.experimental.pallas import tpu as pltpu

# ---- synthetic "mini-BERT" config (small shapes, lane-aligned hidden) ----
B = 2             # batch
S = 8             # sequence length
H = 128           # hidden size
NH = 2            # attention heads
HD = H // NH      # head dim
FF = 4 * H        # intermediate (FFN) size
NL = 2            # encoder layers
VOCAB = 100
N_CLASSES = 3
OUT_PAD = 128     # lane-dense classifier output width (sliced to N_CLASSES outside)
LN_EPS = 1e-12    # BERT layernorm eps


def _layernorm(x, gamma, beta, eps=LN_EPS):
    mu = jnp.mean(x, axis=-1, keepdims=True)
    var = jnp.mean((x - mu) ** 2, axis=-1, keepdims=True)
    return (x - mu) * jax.lax.rsqrt(var + eps) * gamma + beta


# --------------------------- fused Pallas kernel ---------------------------
# grid = (NL,): one grid step per encoder layer; per-layer weights are streamed
# (double-buffered) by Pallas, the hidden state lives in a VMEM scratch.

def fused_bert_kernel(emb_ref, add_mask_ref, emb_g_ref, emb_b_ref,
                      wq_ref, bq_ref, wk_ref, bk_ref, wv_ref, bv_ref,
                      wo_ref, bo_ref, ln1g_ref, ln1b_ref,
                      w1_ref, b1_ref, w2_ref, b2_ref, ln2g_ref, ln2b_ref,
                      pool_w_ref, pool_b_ref, out_w_ref, out_b_ref,
                      logits_ref, x_sc):
    l = pl.program_id(0)

    # --- init: embedding LayerNorm on flattened (B*S, H) hidden state (f32) ---
    @pl.when(l == 0)
    def _():
        x_sc[...] = _layernorm(emb_ref[...], emb_g_ref[...], emb_b_ref[...])

    x = x_sc[...]                                  # (B*S, H) f32
    x_b = x.astype(jnp.bfloat16)                   # bf16 only at the dots
    add_mask = add_mask_ref[...]                   # (B*S, B*S) f32
    scale = 1.0 / math.sqrt(HD)

    # --- one encoder layer per grid step; static head loop (NH=2) ---
    attn_out = None
    for h in range(NH):                            # head-split weights -> no lane slicing
        qh = (jnp.dot(x_b, wq_ref[0, h], preferred_element_type=jnp.float32)
              + bq_ref[0, h]) * scale              # (B*S, HD) f32, scale folded into q
        kh = jnp.dot(x_b, wk_ref[0, h], preferred_element_type=jnp.float32) + bk_ref[0, h]
        vh = jnp.dot(x_b, wv_ref[0, h], preferred_element_type=jnp.float32) + bv_ref[0, h]

        # scores = q @ k^T via dot_general contracting on last dims (no kh.T relayout).
        scores = lax.dot_general(qh.astype(jnp.bfloat16), kh.astype(jnp.bfloat16),
                                 dimension_numbers=(((1,), (1,)), ((), ())),
                                 preferred_element_type=jnp.float32)       # (B*S, B*S)
        # Block-diagonal additive mask: -1e9 across batch (exp underflows to 0),
        # BERT-style -10000 on padded keys within a batch element.
        scores = scores + add_mask
        scores = scores - jnp.max(scores, axis=-1, keepdims=True)
        p = jnp.exp(scores)
        p = p * pl.reciprocal(jnp.sum(p, axis=-1, keepdims=True), approx=True)

        ctx = jnp.dot(p.astype(jnp.bfloat16), vh.astype(jnp.bfloat16),
                      preferred_element_type=jnp.float32)                  # (B*S, HD)
        # Accumulate output projection per head (no head concat/relayout).
        head_out = jnp.dot(ctx.astype(jnp.bfloat16), wo_ref[0, h],
                           preferred_element_type=jnp.float32)             # (B*S, H)
        attn_out = head_out if attn_out is None else attn_out + head_out
    attn_out = attn_out + bo_ref[0]

    x1 = _layernorm(x + attn_out, ln1g_ref[0], ln1b_ref[0])

    h1 = jnp.dot(x1.astype(jnp.bfloat16), w1_ref[0],
                 preferred_element_type=jnp.float32) + b1_ref[0]
    # TODO(synk): HF BERT uses exact erf-GELU; tanh approximation used for safe EUP lowering.
    h1 = jax.nn.gelu(h1, approximate=True)
    ffn = jnp.dot(h1.astype(jnp.bfloat16), w2_ref[0],
                  preferred_element_type=jnp.float32) + b2_ref[0]
    x_new = _layernorm(x1 + ffn, ln2g_ref[0], ln2b_ref[0])
    x_sc[...] = x_new

    # --- epilogue (last layer only): pooler tanh(Linear) -> Dropout(0.3) -> classifier ---
    # Computed over all B*S rows (extra rows are free) so the store is two full
    # unmasked (8,128) tiles; wrapper slices CLS rows 0, S and lanes :N_CLASSES.
    @pl.when(l == NL - 1)
    def _():
        pooled = jnp.tanh(
            jnp.dot(x_new.astype(jnp.bfloat16), pool_w_ref[...],
                    preferred_element_type=jnp.float32) + pool_b_ref[...])
        # nn.Dropout(p=0.3) is identity at inference time (eval mode).
        logits_ref[...] = (
            jnp.dot(pooled.astype(jnp.bfloat16), out_w_ref[...],
                    preferred_element_type=jnp.float32) + out_b_ref[...])


# --------------------------- wrapper ---------------------------

def sentiment_forward(params, input_ids, attention_mask):
    # Embedding gathers (glue) -> flattened (B*S, H) summed embeddings.
    emb = (params["word_emb"][input_ids]
           + params["pos_emb"][None, :, :]
           + params["type_emb"][0][None, None, :])
    emb = emb.reshape(B * S, H).astype(jnp.float32)
    # Embedding dropout (p=0.1 in BERT) is identity at inference.

    # Precompute fused additive attention mask once: (B*S, B*S).
    m = attention_mask.astype(jnp.float32)                          # (B, S)
    key_pad = (1.0 - m.reshape(1, B * S)) * -10000.0                # BERT padding mask
    row_batch = jnp.arange(B * S) // S
    same_batch = row_batch[:, None] == row_batch[None, :]
    add_mask = jnp.where(same_batch, key_pad, -1e9).astype(jnp.float32)

    # Head-split weight layout + one-time bf16 cast of all matmul weights.
    bf = lambda a: a.astype(jnp.bfloat16)
    wq_h = bf(params["wq"].reshape(NL, H, NH, HD).transpose(0, 2, 1, 3))   # (NL,NH,H,HD)
    wk_h = bf(params["wk"].reshape(NL, H, NH, HD).transpose(0, 2, 1, 3))
    wv_h = bf(params["wv"].reshape(NL, H, NH, HD).transpose(0, 2, 1, 3))
    wo_h = bf(params["wo"].reshape(NL, NH, HD, H))                          # (NL,NH,HD,H)
    bq_h = params["bq"].reshape(NL, 1, NH, HD).transpose(0, 2, 1, 3)        # f32 biases
    bk_h = params["bk"].reshape(NL, 1, NH, HD).transpose(0, 2, 1, 3)
    bv_h = params["bv"].reshape(NL, 1, NH, HD).transpose(0, 2, 1, 3)
    w1_b = bf(params["w1"])
    w2_b = bf(params["w2"])
    pool_w_b = bf(params["pool_w"])
    # Lane-dense classifier weights (pad N_CLASSES -> 128 lanes).
    out_w_pad = bf(jnp.zeros((H, OUT_PAD), jnp.float32).at[:, :N_CLASSES].set(params["out_w"]))
    out_b_pad = jnp.zeros((1, OUT_PAD), jnp.float32).at[:, :N_CLASSES].set(params["out_b"])

    def full(shape):
        return pl.BlockSpec(shape, lambda l, _n=len(shape): (0,) * _n)

    def per_layer(shape):
        return pl.BlockSpec((1,) + tuple(shape[1:]),
                            lambda l, _n=len(shape): (l,) + (0,) * (_n - 1))

    grid_spec = pltpu.PrefetchScalarGridSpec(
        num_scalar_prefetch=0,
        grid=(NL,),
        in_specs=[
            full((B * S, H)),            # emb
            full((B * S, B * S)),        # add_mask
            full((1, H)), full((1, H)),  # emb LN gamma/beta
            per_layer((NL, NH, H, HD)), per_layer((NL, NH, 1, HD)),   # wq, bq
            per_layer((NL, NH, H, HD)), per_layer((NL, NH, 1, HD)),   # wk, bk
            per_layer((NL, NH, H, HD)), per_layer((NL, NH, 1, HD)),   # wv, bv
            per_layer((NL, NH, HD, H)), per_layer((NL, 1, H)),        # wo, bo
            per_layer((NL, 1, H)), per_layer((NL, 1, H)),             # ln1 g/b
            per_layer((NL, H, FF)), per_layer((NL, 1, FF)),           # w1, b1
            per_layer((NL, FF, H)), per_layer((NL, 1, H)),            # w2, b2
            per_layer((NL, 1, H)), per_layer((NL, 1, H)),             # ln2 g/b
            full((H, H)), full((1, H)),                               # pooler
            full((H, OUT_PAD)), full((1, OUT_PAD)),                   # classifier
        ],
        out_specs=pl.BlockSpec((B * S, OUT_PAD), lambda l: (0, 0)),
        scratch_shapes=[pltpu.VMEM((B * S, H), jnp.float32)],
    )

    logits_pad = pl.pallas_call(
        fused_bert_kernel,
        out_shape=jax.ShapeDtypeStruct((B * S, OUT_PAD), jnp.float32),
        grid_spec=grid_spec,
        compiler_params=pltpu.CompilerParams(dimension_semantics=("arbitrary",)),
    )(emb, add_mask, params["emb_ln_g"], params["emb_ln_b"],
      wq_h, bq_h, wk_h, bk_h, wv_h, bv_h, wo_h, params["bo"],
      params["ln1g"], params["ln1b"], w1_b, params["b1"], w2_b, params["b2"],
      params["ln2g"], params["ln2b"],
      pool_w_b, params["pool_b"], out_w_pad, out_b_pad)

    # Rows 0, S, 2S, ... are the CLS positions; keep the first N_CLASSES lanes.
    return logits_pad.reshape(B, S, OUT_PAD)[:, 0, :N_CLASSES]


# --------------------------- pure-JAX reference ---------------------------

def reference_forward(params, input_ids, attention_mask):
    emb = (params["word_emb"][input_ids]
           + params["pos_emb"][None, :, :]
           + params["type_emb"][0][None, None, :]).astype(jnp.float32)   # (B,S,H)
    x = _layernorm(emb, params["emb_ln_g"], params["emb_ln_b"])
    add_mask = (1.0 - attention_mask.astype(jnp.float32))[:, None, None, :] * -10000.0
    scale = 1.0 / math.sqrt(HD)
    for l in range(NL):
        q = x @ params["wq"][l] + params["bq"][l]
        k = x @ params["wk"][l] + params["bk"][l]
        v = x @ params["wv"][l] + params["bv"][l]
        qh = q.reshape(B, S, NH, HD).transpose(0, 2, 1, 3)
        kh = k.reshape(B, S, NH, HD).transpose(0, 2, 1, 3)
        vh = v.reshape(B, S, NH, HD).transpose(0, 2, 1, 3)
        scores = jnp.einsum("bhqd,bhkd->bhqk", qh, kh) * scale + add_mask
        p = jax.nn.softmax(scores, axis=-1)
        ctx = jnp.einsum("bhqk,bhkd->bhqd", p, vh).transpose(0, 2, 1, 3).reshape(B, S, H)
        attn_out = ctx @ params["wo"][l] + params["bo"][l]
        x1 = _layernorm(x + attn_out, params["ln1g"][l], params["ln1b"][l])
        h1 = jax.nn.gelu(x1 @ params["w1"][l] + params["b1"][l], approximate=True)
        x = _layernorm(x1 + h1 @ params["w2"][l] + params["b2"][l],
                       params["ln2g"][l], params["ln2b"][l])
    pooled = jnp.tanh(x[:, 0, :] @ params["pool_w"] + params["pool_b"])
    return pooled @ params["out_w"] + params["out_b"]


# --------------------------- params ---------------------------

def init_params(key):
    kit = iter(jax.random.split(key, 32))
    nrm = lambda shape: (0.02 * jax.random.normal(next(kit), shape)).astype(jnp.float32)
    zeros = lambda shape: jnp.zeros(shape, jnp.float32)
    ones = lambda shape: jnp.ones(shape, jnp.float32)
    return {
        "word_emb": nrm((VOCAB, H)),
        "pos_emb": nrm((S, H)),
        "type_emb": nrm((2, H)),
        "emb_ln_g": ones((1, H)), "emb_ln_b": zeros((1, H)),
        # per-layer weights stacked along a leading NL axis
        "wq": nrm((NL, H, H)), "bq": zeros((NL, 1, H)),
        "wk": nrm((NL, H, H)), "bk": zeros((NL, 1, H)),
        "wv": nrm((NL, H, H)), "bv": zeros((NL, 1, H)),
        "wo": nrm((NL, H, H)), "bo": zeros((NL, 1, H)),
        "ln1g": ones((NL, 1, H)), "ln1b": zeros((NL, 1, H)),
        "w1": nrm((NL, H, FF)), "b1": zeros((NL, 1, FF)),
        "w2": nrm((NL, FF, H)), "b2": zeros((NL, 1, H)),
        "ln2g": ones((NL, 1, H)), "ln2b": zeros((NL, 1, H)),
        "pool_w": nrm((H, H)), "pool_b": zeros((1, H)),
        "out_w": nrm((H, N_CLASSES)), "out_b": zeros((1, N_CLASSES)),
    }


if __name__ == "__main__":
    key = jax.random.PRNGKey(0)
    pkey, dkey = jax.random.split(key)
    params = init_params(pkey)

    input_ids = jax.random.randint(dkey, (B, S), 0, VOCAB, dtype=jnp.int32)
    attention_mask = jnp.ones((B, S), dtype=jnp.int32).at[1, -2:].set(0)  # exercise padding

    logits = jax.jit(sentiment_forward)(params, input_ids, attention_mask)
    logits = jax.block_until_ready(logits)

    assert logits.shape == (B, N_CLASSES)
    assert bool(jnp.all(jnp.isfinite(logits)))

    ref = reference_forward(params, input_ids, attention_mask)
    assert bool(jnp.allclose(logits, ref, rtol=2e-2, atol=2e-2)), "mismatch vs pure-JAX reference"

    print("KERNEL_OK")
</pallas_src>

<mosaic_0001>
module attributes {stable_mosaic.version = 11 : i64} {
  func.func @fused_bert_kernel(%arg0: i32, %arg1: memref<16x128xf32, #tpu.memory_space<vmem>>, %arg2: memref<16x16xf32, #tpu.memory_space<vmem>>, %arg3: memref<1x128xf32, #tpu.memory_space<vmem>>, %arg4: memref<1x128xf32, #tpu.memory_space<vmem>>, %arg5: memref<1x2x128x64xbf16, #tpu.memory_space<vmem>>, %arg6: memref<1x2x1x64xf32, #tpu.memory_space<vmem>>, %arg7: memref<1x2x128x64xbf16, #tpu.memory_space<vmem>>, %arg8: memref<1x2x1x64xf32, #tpu.memory_space<vmem>>, %arg9: memref<1x2x128x64xbf16, #tpu.memory_space<vmem>>, %arg10: memref<1x2x1x64xf32, #tpu.memory_space<vmem>>, %arg11: memref<1x2x64x128xbf16, #tpu.memory_space<vmem>>, %arg12: memref<1x1x128xf32, #tpu.memory_space<vmem>>, %arg13: memref<1x1x128xf32, #tpu.memory_space<vmem>>, %arg14: memref<1x1x128xf32, #tpu.memory_space<vmem>>, %arg15: memref<1x128x512xbf16, #tpu.memory_space<vmem>>, %arg16: memref<1x1x512xf32, #tpu.memory_space<vmem>>, %arg17: memref<1x512x128xbf16, #tpu.memory_space<vmem>>, %arg18: memref<1x1x128xf32, #tpu.memory_space<vmem>>, %arg19: memref<1x1x128xf32, #tpu.memory_space<vmem>>, %arg20: memref<1x1x128xf32, #tpu.memory_space<vmem>>, %arg21: memref<128x128xbf16, #tpu.memory_space<vmem>>, %arg22: memref<1x128xf32, #tpu.memory_space<vmem>>, %arg23: memref<128x128xbf16, #tpu.memory_space<vmem>>, %arg24: memref<1x128xf32, #tpu.memory_space<vmem>>, %arg25: memref<16x128xf32, #tpu.memory_space<vmem>>, %arg26: memref<16x128xf32, #tpu.memory_space<vmem>>) attributes {dimension_semantics = [#tpu.dimension_semantics<arbitrary>], iteration_bounds = array<i64: 2>, scalar_prefetch = 0 : i64, scratch_operands = 1 : i64, tpu.core_type = #tpu.core_type<tc>, window_params = [{pipeline_mode = #tpu.pipeline_mode<synchronous>, transform_indices = @transform_0, window_bounds = array<i64: 16, 128>}, {pipeline_mode = #tpu.pipeline_mode<synchronous>, transform_indices = @transform_1, window_bounds = array<i64: 16, 16>}, {pipeline_mode = #tpu.pipeline_mode<synchronous>, transform_indices = @transform_2, window_bounds = array<i64: 1, 128>}, {pipeline_mode = #tpu.pipeline_mode<synchronous>, transform_indices = @transform_3, window_bounds = array<i64: 1, 128>}, {transform_indices = @transform_4, window_bounds = array<i64: 1, 2, 128, 64>}, {transform_indices = @transform_5, window_bounds = array<i64: 1, 2, 1, 64>}, {transform_indices = @transform_6, window_bounds = array<i64: 1, 2, 128, 64>}, {transform_indices = @transform_7, window_bounds = array<i64: 1, 2, 1, 64>}, {transform_indices = @transform_8, window_bounds = array<i64: 1, 2, 128, 64>}, {transform_indices = @transform_9, window_bounds = array<i64: 1, 2, 1, 64>}, {transform_indices = @transform_10, window_bounds = array<i64: 1, 2, 64, 128>}, {transform_indices = @transform_11, window_bounds = array<i64: 1, 1, 128>}, {transform_indices = @transform_12, window_bounds = array<i64: 1, 1, 128>}, {transform_indices = @transform_13, window_bounds = array<i64: 1, 1, 128>}, {transform_indices = @transform_14, window_bounds = array<i64: 1, 128, 512>}, {transform_indices = @transform_15, window_bounds = array<i64: 1, 1, 512>}, {transform_indices = @transform_16, window_bounds = array<i64: 1, 512, 128>}, {transform_indices = @transform_17, window_bounds = array<i64: 1, 1, 128>}, {transform_indices = @transform_18, window_bounds = array<i64: 1, 1, 128>}, {transform_indices = @transform_19, window_bounds = array<i64: 1, 1, 128>}, {pipeline_mode = #tpu.pipeline_mode<synchronous>, transform_indices = @transform_20, window_bounds = array<i64: 128, 128>}, {pipeline_mode = #tpu.pipeline_mode<synchronous>, transform_indices = @transform_21, window_bounds = array<i64: 1, 128>}, {pipeline_mode = #tpu.pipeline_mode<synchronous>, transform_indices = @transform_22, window_bounds = array<i64: 128, 128>}, {pipeline_mode = #tpu.pipeline_mode<synchronous>, transform_indices = @transform_23, window_bounds = array<i64: 1, 128>}, {pipeline_mode = #tpu.pipeline_mode<synchronous>, transform_indices = @transform_24, window_bounds = array<i64: 16, 128>}]} {
    %c0_i32 = arith.constant 0 : i32
    %0 = arith.cmpi eq, %arg0, %c0_i32 : i32
    %1 = arith.extui %0 : i1 to i32
    %c0_i32_0 = arith.constant 0 : i32
    %2 = arith.cmpi ne, %1, %c0_i32_0 : i32
    scf.if %2 {
      %c0_122 = arith.constant 0 : index
      %c0_123 = arith.constant 0 : index
      %186 = vector.load %arg1[%c0_122, %c0_123] : memref<16x128xf32, #tpu.memory_space<vmem>>, vector<16x128xf32>
      %c0_124 = arith.constant 0 : index
      %c0_125 = arith.constant 0 : index
      %187 = vector.load %arg3[%c0_124, %c0_125] : memref<1x128xf32, #tpu.memory_space<vmem>>, vector<1x128xf32>
      %c0_126 = arith.constant 0 : index
      %c0_127 = arith.constant 0 : index
      %188 = vector.load %arg4[%c0_126, %c0_127] : memref<1x128xf32, #tpu.memory_space<vmem>>, vector<1x128xf32>
      %cst_128 = arith.constant dense<0.000000e+00> : vector<16xf32>
      %189 = vector.multi_reduction <add>, %186, %cst_128 [1] : vector<16x128xf32> to vector<16xf32>
      %190 = vector.shape_cast %189 : vector<16xf32> to vector<16x1xf32>
      %cst_129 = arith.constant 1.280000e+02 : f32
      %191 = vector.broadcast %cst_129 : f32 to vector<16x1xf32>
      %192 = arith.divf %190, %191 : vector<16x1xf32>
      %193 = vector.broadcast %192 : vector<16x1xf32> to vector<16x128xf32>
      %194 = arith.subf %186, %193 : vector<16x128xf32>
      %195 = arith.mulf %194, %194 : vector<16x128xf32>
      %cst_130 = arith.constant dense<0.000000e+00> : vector<16xf32>
      %196 = vector.multi_reduction <add>, %195, %cst_130 [1] : vector<16x128xf32> to vector<16xf32>
      %197 = vector.shape_cast %196 : vector<16xf32> to vector<16x1xf32>
      %cst_131 = arith.constant 1.280000e+02 : f32
      %198 = vector.broadcast %cst_131 : f32 to vector<16x1xf32>
      %199 = arith.divf %197, %198 : vector<16x1xf32>
      %200 = vector.broadcast %192 : vector<16x1xf32> to vector<16x128xf32>
      %201 = arith.subf %186, %200 : vector<16x128xf32>
      %cst_132 = arith.constant 9.99999996E-13 : f32
      %202 = vector.broadcast %cst_132 : f32 to vector<16x1xf32>
      %203 = arith.addf %199, %202 : vector<16x1xf32>
      %204 = math.rsqrt %203 : vector<16x1xf32>
      %205 = vector.broadcast %204 : vector<16x1xf32> to vector<16x128xf32>
      %206 = arith.mulf %201, %205 : vector<16x128xf32>
      %207 = vector.broadcast %187 : vector<1x128xf32> to vector<16x128xf32>
      %208 = arith.mulf %206, %207 : vector<16x128xf32>
      %209 = vector.broadcast %188 : vector<1x128xf32> to vector<16x128xf32>
      %210 = arith.addf %208, %209 : vector<16x128xf32>
      %c0_133 = arith.constant 0 : index
      %c0_134 = arith.constant 0 : index
      %211 = vector.load %arg26[%c0_133, %c0_134] : memref<16x128xf32, #tpu.memory_space<vmem>>, vector<16x128xf32>
      tpu.vector_store %arg26[%c0_133, %c0_134], %210 {strides = array<i32>} : memref<16x128xf32, #tpu.memory_space<vmem>>, vector<16x128xf32>,
    } else {
    }
    %c0 = arith.constant 0 : index
    %c0_1 = arith.constant 0 : index
    %3 = vector.load %arg26[%c0, %c0_1] : memref<16x128xf32, #tpu.memory_space<vmem>>, vector<16x128xf32>
    %4 = arith.truncf %3 : vector<16x128xf32> to vector<16x128xbf16>
    %c0_2 = arith.constant 0 : index
    %c0_3 = arith.constant 0 : index
    %5 = vector.load %arg2[%c0_2, %c0_3] : memref<16x16xf32, #tpu.memory_space<vmem>>, vector<16x16xf32>
    %c0_4 = arith.constant 0 : index
    %c0_5 = arith.constant 0 : index
    %c0_6 = arith.constant 0 : index
    %c0_7 = arith.constant 0 : index
    %6 = vector.load %arg5[%c0_4, %c0_5, %c0_6, %c0_7] : memref<1x2x128x64xbf16, #tpu.memory_space<vmem>>, vector<1x1x128x64xbf16>
    %7 = vector.shape_cast %6 : vector<1x1x128x64xbf16> to vector<128x64xbf16>
    %cst = arith.constant dense<0.000000e+00> : vector<16x64xf32>
    %8 = tpu.matmul %4, %7, %cst {dimension_numbers = #tpu.dot_dimension_numbers<[1], [0], [0], [1], [0, 0, 1, 1], [], []>} : vector<16x128xbf16>, vector<128x64xbf16>, vector<16x64xf32> -> vector<16x64xf32>
    %c0_8 = arith.constant 0 : index
    %c0_9 = arith.constant 0 : index
    %c0_10 = arith.constant 0 : index
    %c0_11 = arith.constant 0 : index
    %9 = vector.load %arg6[%c0_8, %c0_9, %c0_10, %c0_11] : memref<1x2x1x64xf32, #tpu.memory_space<vmem>>, vector<1x1x1x64xf32>
    %10 = vector.shape_cast %9 : vector<1x1x1x64xf32> to vector<1x64xf32>
    %11 = vector.broadcast %10 : vector<1x64xf32> to vector<16x64xf32>
    %12 = arith.addf %8, %11 : vector<16x64xf32>
    %cst_12 = arith.constant 1.250000e-01 : f32
    %13 = vector.broadcast %cst_12 : f32 to vector<16x64xf32>
    %14 = arith.mulf %12, %13 : vector<16x64xf32>
    %c0_13 = arith.constant 0 : index
    %c0_14 = arith.constant 0 : index
    %c0_15 = arith.constant 0 : index
    %c0_16 = arith.constant 0 : index
    %15 = vector.load %arg7[%c0_13, %c0_14, %c0_15, %c0_16] : memref<1x2x128x64xbf16, #tpu.memory_space<vmem>>, vector<1x1x128x64xbf16>
    %16 = vector.shape_cast %15 : vector<1x1x128x64xbf16> to vector<128x64xbf16>
    %cst_17 = arith.constant dense<0.000000e+00> : vector<16x64xf32>
    %17 = tpu.matmul %4, %16, %cst_17 {dimension_numbers = #tpu.dot_dimension_numbers<[1], [0], [0], [1], [0, 0, 1, 1], [], []>} : vector<16x128xbf16>, vector<128x64xbf16>, vector<16x64xf32> -> vector<16x64xf32>
    %c0_18 = arith.constant 0 : index
    %c0_19 = arith.constant 0 : index
    %c0_20 = arith.constant 0 : index
    %c0_21 = arith.constant 0 : index
    %18 = vector.load %arg8[%c0_18, %c0_19, %c0_20, %c0_21] : memref<1x2x1x64xf32, #tpu.memory_space<vmem>>, vector<1x1x1x64xf32>
    %19 = vector.shape_cast %18 : vector<1x1x1x64xf32> to vector<1x64xf32>
    %20 = vector.broadcast %19 : vector<1x64xf32> to vector<16x64xf32>
    %21 = arith.addf %17, %20 : vector<16x64xf32>
    %c0_22 = arith.constant 0 : index
    %c0_23 = arith.constant 0 : index
    %c0_24 = arith.constant 0 : index
    %c0_25 = arith.constant 0 : index
    %22 = vector.load %arg9[%c0_22, %c0_23, %c0_24, %c0_25] : memref<1x2x128x64xbf16, #tpu.memory_space<vmem>>, vector<1x1x128x64xbf16>
    %23 = vector.shape_cast %22 : vector<1x1x128x64xbf16> to vector<128x64xbf16>
    %cst_26 = arith.constant dense<0.000000e+00> : vector<16x64xf32>
    %24 = tpu.matmul %4, %23, %cst_26 {dimension_numbers = #tpu.dot_dimension_numbers<[1], [0], [0], [1], [0, 0, 1, 1], [], []>} : vector<16x128xbf16>, vector<128x64xbf16>, vector<16x64xf32> -> vector<16x64xf32>
    %c0_27 = arith.constant 0 : index
    %c0_28 = arith.constant 0 : index
    %c0_29 = arith.constant 0 : index
    %c0_30 = arith.constant 0 : index
    %25 = vector.load %arg10[%c0_27, %c0_28, %c0_29, %c0_30] : memref<1x2x1x64xf32, #tpu.memory_space<vmem>>, vector<1x1x1x64xf32>
    %26 = vector.shape_cast %25 : vector<1x1x1x64xf32> to vector<1x64xf32>
    %27 = vector.broadcast %26 : vector<1x64xf32> to vector<16x64xf32>
    %28 = arith.addf %24, %27 : vector<16x64xf32>
    %29 = arith.truncf %14 : vector<16x64xf32> to vector<16x64xbf16>
    %30 = arith.truncf %21 : vector<16x64xf32> to vector<16x64xbf16>
    %cst_31 = arith.constant dense<0.000000e+00> : vector<16x16xf32>
    %31 = tpu.matmul %29, %30, %cst_31 {dimension_numbers = #tpu.dot_dimension_numbers<[1], [1], [0], [0], [0, 0, 1, 0], [], []>} : vector<16x64xbf16>, vector<16x64xbf16>, vector<16x16xf32> -> vector<16x16xf32>
    %32 = arith.addf %31, %5 : vector<16x16xf32>
    %cst_32 = arith.constant dense<0xFF800000> : vector<16xf32>
    %33 = vector.multi_reduction <maximumf>, %32, %cst_32 [1] : vector<16x16xf32> to vector<16xf32>
    %34 = vector.shape_cast %33 : vector<16xf32> to vector<16x1xf32>
    %35 = vector.broadcast %34 : vector<16x1xf32> to vector<16x16xf32>
    %36 = arith.subf %32, %35 : vector<16x16xf32>
    %37 = math.exp %36 : vector<16x16xf32>
    %cst_33 = arith.constant dense<0.000000e+00> : vector<16xf32>
    %38 = vector.multi_reduction <add>, %37, %cst_33 [1] : vector<16x16xf32> to vector<16xf32>
    %39 = vector.shape_cast %38 : vector<16xf32> to vector<16x1xf32>
    %40 = tpu.reciprocal %39 {approx = true} : vector<16x1xf32> -> vector<16x1xf32>
    %41 = vector.broadcast %40 : vector<16x1xf32> to vector<16x16xf32>
    %42 = arith.mulf %37, %41 : vector<16x16xf32>
    %43 = arith.truncf %42 : vector<16x16xf32> to vector<16x16xbf16>
    %44 = arith.truncf %28 : vector<16x64xf32> to vector<16x64xbf16>
    %cst_34 = arith.constant dense<0.000000e+00> : vector<16x64xf32>
    %45 = tpu.matmul %43, %44, %cst_34 {dimension_numbers = #tpu.dot_dimension_numbers<[1], [0], [0], [1], [0, 0, 1, 1], [], []>} : vector<16x16xbf16>, vector<16x64xbf16>, vector<16x64xf32> -> vector<16x64xf32>
    %46 = arith.truncf %45 : vector<16x64xf32> to vector<16x64xbf16>
    %c0_35 = arith.constant 0 : index
    %c0_36 = arith.constant 0 : index
    %c0_37 = arith.constant 0 : index
    %c0_38 = arith.constant 0 : index
    %47 = vector.load %arg11[%c0_35, %c0_36, %c0_37, %c0_38] : memref<1x2x64x128xbf16, #tpu.memory_space<vmem>>, vector<1x1x64x128xbf16>
    %48 = vector.shape_cast %47 : vector<1x1x64x128xbf16> to vector<64x128xbf16>
    %cst_39 = arith.constant dense<0.000000e+00> : vector<16x128xf32>
    %49 = tpu.matmul %46, %48, %cst_39 {dimension_numbers = #tpu.dot_dimension_numbers<[1], [0], [0], [1], [0, 0, 1, 1], [], []>} : vector<16x64xbf16>, vector<64x128xbf16>, vector<16x128xf32> -> vector<16x128xf32>
    %c0_40 = arith.constant 0 : index
    %c1 = arith.constant 1 : index
    %c0_41 = arith.constant 0 : index
    %c0_42 = arith.constant 0 : index
    %50 = vector.load %arg5[%c0_40, %c1, %c0_41, %c0_42] : memref<1x2x128x64xbf16, #tpu.memory_space<vmem>>, vector<1x1x128x64xbf16>
    %51 = vector.shape_cast %50 : vector<1x1x128x64xbf16> to vector<128x64xbf16>
    %cst_43 = arith.constant dense<0.000000e+00> : vector<16x64xf32>
    %52 = tpu.matmul %4, %51, %cst_43 {dimension_numbers = #tpu.dot_dimension_numbers<[1], [0], [0], [1], [0, 0, 1, 1], [], []>} : vector<16x128xbf16>, vector<128x64xbf16>, vector<16x64xf32> -> vector<16x64xf32>
    %c0_44 = arith.constant 0 : index
    %c1_45 = arith.constant 1 : index
    %c0_46 = arith.constant 0 : index
    %c0_47 = arith.constant 0 : index
    %53 = vector.load %arg6[%c0_44, %c1_45, %c0_46, %c0_47] : memref<1x2x1x64xf32, #tpu.memory_space<vmem>>, vector<1x1x1x64xf32>
    %54 = vector.shape_cast %53 : vector<1x1x1x64xf32> to vector<1x64xf32>
    %55 = vector.broadcast %54 : vector<1x64xf32> to vector<16x64xf32>
    %56 = arith.addf %52, %55 : vector<16x64xf32>
    %cst_48 = arith.constant 1.250000e-01 : f32
    %57 = vector.broadcast %cst_48 : f32 to vector<16x64xf32>
    %58 = arith.mulf %56, %57 : vector<16x64xf32>
    %c0_49 = arith.constant 0 : index
    %c1_50 = arith.constant 1 : index
    %c0_51 = arith.constant 0 : index
    %c0_52 = arith.constant 0 : index
    %59 = vector.load %arg7[%c0_49, %c1_50, %c0_51, %c0_52] : memref<1x2x128x64xbf16, #tpu.memory_space<vmem>>, vector<1x1x128x64xbf16>
    %60 = vector.shape_cast %59 : vector<1x1x128x64xbf16> to vector<128x64xbf16>
    %cst_53 = arith.constant dense<0.000000e+00> : vector<16x64xf32>
    %61 = tpu.matmul %4, %60, %cst_53 {dimension_numbers = #tpu.dot_dimension_numbers<[1], [0], [0], [1], [0, 0, 1, 1], [], []>} : vector<16x128xbf16>, vector<128x64xbf16>, vector<16x64xf32> -> vector<16x64xf32>
    %c0_54 = arith.constant 0 : index
    %c1_55 = arith.constant 1 : index
    %c0_56 = arith.constant 0 : index
    %c0_57 = arith.constant 0 : index
    %62 = vector.load %arg8[%c0_54, %c1_55, %c0_56, %c0_57] : memref<1x2x1x64xf32, #tpu.memory_space<vmem>>, vector<1x1x1x64xf32>
    %63 = vector.shape_cast %62 : vector<1x1x1x64xf32> to vector<1x64xf32>
    %64 = vector.broadcast %63 : vector<1x64xf32> to vector<16x64xf32>
    %65 = arith.addf %61, %64 : vector<16x64xf32>
    %c0_58 = arith.constant 0 : index
    %c1_59 = arith.constant 1 : index
    %c0_60 = arith.constant 0 : index
    %c0_61 = arith.constant 0 : index
    %66 = vector.load %arg9[%c0_58, %c1_59, %c0_60, %c0_61] : memref<1x2x128x64xbf16, #tpu.memory_space<vmem>>, vector<1x1x128x64xbf16>
    %67 = vector.shape_cast %66 : vector<1x1x128x64xbf16> to vector<128x64xbf16>
    %cst_62 = arith.constant dense<0.000000e+00> : vector<16x64xf32>
    %68 = tpu.matmul %4, %67, %cst_62 {dimension_numbers = #tpu.dot_dimension_numbers<[1], [0], [0], [1], [0, 0, 1, 1], [], []>} : vector<16x128xbf16>, vector<128x64xbf16>, vector<16x64xf32> -> vector<16x64xf32>
    %c0_63 = arith.constant 0 : index
    %c1_64 = arith.constant 1 : index
    %c0_65 = arith.constant 0 : index
    %c0_66 = arith.constant 0 : index
    %69 = vector.load %arg10[%c0_63, %c1_64, %c0_65, %c0_66] : memref<1x2x1x64xf32, #tpu.memory_space<vmem>>, vector<1x1x1x64xf32>
    %70 = vector.shape_cast %69 : vector<1x1x1x64xf32> to vector<1x64xf32>
    %71 = vector.broadcast %70 : vector<1x64xf32> to vector<16x64xf32>
    %72 = arith.addf %68, %71 : vector<16x64xf32>
    %73 = arith.truncf %58 : vector<16x64xf32> to vector<16x64xbf16>
    %74 = arith.truncf %65 : vector<16x64xf32> to vector<16x64xbf16>
    %cst_67 = arith.constant dense<0.000000e+00> : vector<16x16xf32>
    %75 = tpu.matmul %73, %74, %cst_67 {dimension_numbers = #tpu.dot_dimension_numbers<[1], [1], [0], [0], [0, 0, 1, 0], [], []>} : vector<16x64xbf16>, vector<16x64xbf16>, vector<16x16xf32> -> vector<16x16xf32>
    %76 = arith.addf %75, %5 : vector<16x16xf32>
    %cst_68 = arith.constant dense<0xFF800000> : vector<16xf32>
    %77 = vector.multi_reduction <maximumf>, %76, %cst_68 [1] : vector<16x16xf32> to vector<16xf32>
    %78 = vector.shape_cast %77 : vector<16xf32> to vector<16x1xf32>
    %79 = vector.broadcast %78 : vector<16x1xf32> to vector<16x16xf32>
    %80 = arith.subf %76, %79 : vector<16x16xf32>
    %81 = math.exp %80 : vector<16x16xf32>
    %cst_69 = arith.constant dense<0.000000e+00> : vector<16xf32>
    %82 = vector.multi_reduction <add>, %81, %cst_69 [1] : vector<16x16xf32> to vector<16xf32>
    %83 = vector.shape_cast %82 : vector<16xf32> to vector<16x1xf32>
    %84 = tpu.reciprocal %83 {approx = true} : vector<16x1xf32> -> vector<16x1xf32>
    %85 = vector.broadcast %84 : vector<16x1xf32> to vector<16x16xf32>
    %86 = arith.mulf %81, %85 : vector<16x16xf32>
    %87 = arith.truncf %86 : vector<16x16xf32> to vector<16x16xbf16>
    %88 = arith.truncf %72 : vector<16x64xf32> to vector<16x64xbf16>
    %cst_70 = arith.constant dense<0.000000e+00> : vector<16x64xf32>
    %89 = tpu.matmul %87, %88, %cst_70 {dimension_numbers = #tpu.dot_dimension_numbers<[1], [0], [0], [1], [0, 0, 1, 1], [], []>} : vector<16x16xbf16>, vector<16x64xbf16>, vector<16x64xf32> -> vector<16x64xf32>
    %90 = arith.truncf %89 : vector<16x64xf32> to vector<16x64xbf16>
    %c0_71 = arith.constant 0 : index
    %c1_72 = arith.constant 1 : index
    %c0_73 = arith.constant 0 : index
    %c0_74 = arith.constant 0 : index
    %91 = vector.load %arg11[%c0_71, %c1_72, %c0_73, %c0_74] : memref<1x2x64x128xbf16, #tpu.memory_space<vmem>>, vector<1x1x64x128xbf16>
    %92 = vector.shape_cast %91 : vector<1x1x64x128xbf16> to vector<64x128xbf16>
    %cst_75 = arith.constant dense<0.000000e+00> : vector<16x128xf32>
    %93 = tpu.matmul %90, %92, %cst_75 {dimension_numbers = #tpu.dot_dimension_numbers<[1], [0], [0], [1], [0, 0, 1, 1], [], []>} : vector<16x64xbf16>, vector<64x128xbf16>, vector<16x128xf32> -> vector<16x128xf32>
    %94 = arith.addf %49, %93 : vector<16x128xf32>
    %c0_76 = arith.constant 0 : index
    %c0_77 = arith.constant 0 : index
    %c0_78 = arith.constant 0 : index
    %95 = vector.load %arg12[%c0_76, %c0_77, %c0_78] : memref<1x1x128xf32, #tpu.memory_space<vmem>>, vector<1x1x128xf32>
    %96 = vector.shape_cast %95 : vector<1x1x128xf32> to vector<1x128xf32>
    %97 = vector.broadcast %96 : vector<1x128xf32> to vector<16x128xf32>
    %98 = arith.addf %94, %97 : vector<16x128xf32>
    %99 = arith.addf %3, %98 : vector<16x128xf32>
    %c0_79 = arith.constant 0 : index
    %c0_80 = arith.constant 0 : index
    %c0_81 = arith.constant 0 : index
    %100 = vector.load %arg13[%c0_79, %c0_80, %c0_81] : memref<1x1x128xf32, #tpu.memory_space<vmem>>, vector<1x1x128xf32>
    %101 = vector.shape_cast %100 : vector<1x1x128xf32> to vector<1x128xf32>
    %c0_82 = arith.constant 0 : index
    %c0_83 = arith.constant 0 : index
    %c0_84 = arith.constant 0 : index
    %102 = vector.load %arg14[%c0_82, %c0_83, %c0_84] : memref<1x1x128xf32, #tpu.memory_space<vmem>>, vector<1x1x128xf32>
    %103 = vector.shape_cast %102 : vector<1x1x128xf32> to vector<1x128xf32>
    %cst_85 = arith.constant dense<0.000000e+00> : vector<16xf32>
    %104 = vector.multi_reduction <add>, %99, %cst_85 [1] : vector<16x128xf32> to vector<16xf32>
    %105 = vector.shape_cast %104 : vector<16xf32> to vector<16x1xf32>
    %cst_86 = arith.constant 1.280000e+02 : f32
    %106 = vector.broadcast %cst_86 : f32 to vector<16x1xf32>
    %107 = arith.divf %105, %106 : vector<16x1xf32>
    %108 = vector.broadcast %107 : vector<16x1xf32> to vector<16x128xf32>
    %109 = arith.subf %99, %108 : vector<16x128xf32>
    %110 = arith.mulf %109, %109 : vector<16x128xf32>
    %cst_87 = arith.constant dense<0.000000e+00> : vector<16xf32>
    %111 = vector.multi_reduction <add>, %110, %cst_87 [1] : vector<16x128xf32> to vector<16xf32>
    %112 = vector.shape_cast %111 : vector<16xf32> to vector<16x1xf32>
    %cst_88 = arith.constant 1.280000e+02 : f32
    %113 = vector.broadcast %cst_88 : f32 to vector<16x1xf32>
    %114 = arith.divf %112, %113 : vector<16x1xf32>
    %115 = vector.broadcast %107 : vector<16x1xf32> to vector<16x128xf32>
    %116 = arith.subf %99, %115 : vector<16x128xf32>
    %cst_89 = arith.constant 9.99999996E-13 : f32
    %117 = vector.broadcast %cst_89 : f32 to vector<16x1xf32>
    %118 = arith.addf %114, %117 : vector<16x1xf32>
    %119 = math.rsqrt %118 : vector<16x1xf32>
    %120 = vector.broadcast %119 : vector<16x1xf32> to vector<16x128xf32>
    %121 = arith.mulf %116, %120 : vector<16x128xf32>
    %122 = vector.broadcast %101 : vector<1x128xf32> to vector<16x128xf32>
    %123 = arith.mulf %121, %122 : vector<16x128xf32>
    %124 = vector.broadcast %103 : vector<1x128xf32> to vector<16x128xf32>
    %125 = arith.addf %123, %124 : vector<16x128xf32>
    %126 = arith.truncf %125 : vector<16x128xf32> to vector<16x128xbf16>
    %c0_90 = arith.constant 0 : index
    %c0_91 = arith.constant 0 : index
    %c0_92 = arith.constant 0 : index
    %127 = vector.load %arg15[%c0_90, %c0_91, %c0_92] : memref<1x128x512xbf16, #tpu.memory_space<vmem>>, vector<1x128x512xbf16>
    %128 = vector.shape_cast %127 : vector<1x128x512xbf16> to vector<128x512xbf16>
    %cst_93 = arith.constant dense<0.000000e+00> : vector<16x512xf32>
    %129 = tpu.matmul %126, %128, %cst_93 {dimension_numbers = #tpu.dot_dimension_numbers<[1], [0], [0], [1], [0, 0, 1, 1], [], []>} : vector<16x128xbf16>, vector<128x512xbf16>, vector<16x512xf32> -> vector<16x512xf32>
    %c0_94 = arith.constant 0 : index
    %c0_95 = arith.constant 0 : index
    %c0_96 = arith.constant 0 : index
    %130 = vector.load %arg16[%c0_94, %c0_95, %c0_96] : memref<1x1x512xf32, #tpu.memory_space<vmem>>, vector<1x1x512xf32>
    %131 = vector.shape_cast %130 : vector<1x1x512xf32> to vector<1x512xf32>
    %132 = vector.broadcast %131 : vector<1x512xf32> to vector<16x512xf32>
    %133 = arith.addf %129, %132 : vector<16x512xf32>
    %134 = arith.mulf %133, %133 : vector<16x512xf32>
    %135 = arith.mulf %133, %134 : vector<16x512xf32>
    %cst_97 = arith.constant 4.471500e-02 : f32
    %136 = vector.broadcast %cst_97 : f32 to vector<16x512xf32>
    %137 = arith.mulf %136, %135 : vector<16x512xf32>
    %138 = arith.addf %133, %137 : vector<16x512xf32>
    %cst_98 = arith.constant 0.797884583 : f32
    %139 = vector.broadcast %cst_98 : f32 to vector<16x512xf32>
    %140 = arith.mulf %139, %138 : vector<16x512xf32>
    %141 = math.tanh %140 : vector<16x512xf32>
    %cst_99 = arith.constant 1.000000e+00 : f32
    %142 = vector.broadcast %cst_99 : f32 to vector<16x512xf32>
    %143 = arith.addf %142, %141 : vector<16x512xf32>
    %cst_100 = arith.constant 5.000000e-01 : f32
    %144 = vector.broadcast %cst_100 : f32 to vector<16x512xf32>
    %145 = arith.mulf %144, %143 : vector<16x512xf32>
    %146 = arith.mulf %133, %145 : vector<16x512xf32>
    %147 = arith.truncf %146 : vector<16x512xf32> to vector<16x512xbf16>
    %c0_101 = arith.constant 0 : index
    %c0_102 = arith.constant 0 : index
    %c0_103 = arith.constant 0 : index
    %148 = vector.load %arg17[%c0_101, %c0_102, %c0_103] : memref<1x512x128xbf16, #tpu.memory_space<vmem>>, vector<1x512x128xbf16>
    %149 = vector.shape_cast %148 : vector<1x512x128xbf16> to vector<512x128xbf16>
    %cst_104 = arith.constant dense<0.000000e+00> : vector<16x128xf32>
    %150 = tpu.matmul %147, %149, %cst_104 {dimension_numbers = #tpu.dot_dimension_numbers<[1], [0], [0], [1], [0, 0, 1, 1], [], []>} : vector<16x512xbf16>, vector<512x128xbf16>, vector<16x128xf32> -> vector<16x128xf32>
    %c0_105 = arith.constant 0 : index
    %c0_106 = arith.constant 0 : index
    %c0_107 = arith.constant 0 : index
    %151 = vector.load %arg18[%c0_105, %c0_106, %c0_107] : memref<1x1x128xf32, #tpu.memory_space<vmem>>, vector<1x1x128xf32>
    %152 = vector.shape_cast %151 : vector<1x1x128xf32> to vector<1x128xf32>
    %153 = vector.broadcast %152 : vector<1x128xf32> to vector<16x128xf32>
    %154 = arith.addf %150, %153 : vector<16x128xf32>
    %155 = arith.addf %125, %154 : vector<16x128xf32>
    %c0_108 = arith.constant 0 : index
    %c0_109 = arith.constant 0 : index
    %c0_110 = arith.constant 0 : index
    %156 = vector.load %arg19[%c0_108, %c0_109, %c0_110] : memref<1x1x128xf32, #tpu.memory_space<vmem>>, vector<1x1x128xf32>
    %157 = vector.shape_cast %156 : vector<1x1x128xf32> to vector<1x128xf32>
    %c0_111 = arith.constant 0 : index
    %c0_112 = arith.constant 0 : index
    %c0_113 = arith.constant 0 : index
    %158 = vector.load %arg20[%c0_111, %c0_112, %c0_113] : memref<1x1x128xf32, #tpu.memory_space<vmem>>, vector<1x1x128xf32>
    %159 = vector.shape_cast %158 : vector<1x1x128xf32> to vector<1x128xf32>
    %cst_114 = arith.constant dense<0.000000e+00> : vector<16xf32>
    %160 = vector.multi_reduction <add>, %155, %cst_114 [1] : vector<16x128xf32> to vector<16xf32>
    %161 = vector.shape_cast %160 : vector<16xf32> to vector<16x1xf32>
    %cst_115 = arith.constant 1.280000e+02 : f32
    %162 = vector.broadcast %cst_115 : f32 to vector<16x1xf32>
    %163 = arith.divf %161, %162 : vector<16x1xf32>
    %164 = vector.broadcast %163 : vector<16x1xf32> to vector<16x128xf32>
    %165 = arith.subf %155, %164 : vector<16x128xf32>
    %166 = arith.mulf %165, %165 : vector<16x128xf32>
    %cst_116 = arith.constant dense<0.000000e+00> : vector<16xf32>
    %167 = vector.multi_reduction <add>, %166, %cst_116 [1] : vector<16x128xf32> to vector<16xf32>
    %168 = vector.shape_cast %167 : vector<16xf32> to vector<16x1xf32>
    %cst_117 = arith.constant 1.280000e+02 : f32
    %169 = vector.broadcast %cst_117 : f32 to vector<16x1xf32>
    %170 = arith.divf %168, %169 : vector<16x1xf32>
    %171 = vector.broadcast %163 : vector<16x1xf32> to vector<16x128xf32>
    %172 = arith.subf %155, %171 : vector<16x128xf32>
    %cst_118 = arith.constant 9.99999996E-13 : f32
    %173 = vector.broadcast %cst_118 : f32 to vector<16x1xf32>
    %174 = arith.addf %170, %173 : vector<16x1xf32>
    %175 = math.rsqrt %174 : vector<16x1xf32>
    %176 = vector.broadcast %175 : vector<16x1xf32> to vector<16x128xf32>
    %177 = arith.mulf %172, %176 : vector<16x128xf32>
    %178 = vector.broadcast %157 : vector<1x128xf32> to vector<16x128xf32>
    %179 = arith.mulf %177, %178 : vector<16x128xf32>
    %180 = vector.broadcast %159 : vector<1x128xf32> to vector<16x128xf32>
    %181 = arith.addf %179, %180 : vector<16x128xf32>
    %c0_119 = arith.constant 0 : index
    %c0_120 = arith.constant 0 : index
    %182 = vector.load %arg26[%c0_119, %c0_120] : memref<16x128xf32, #tpu.memory_space<vmem>>, vector<16x128xf32>
    tpu.vector_store %arg26[%c0_119, %c0_120], %181 {strides = array<i32>} : memref<16x128xf32, #tpu.memory_space<vmem>>, vector<16x128xf32>,
    %c1_i32 = arith.constant 1 : i32
    %183 = arith.cmpi eq, %arg0, %c1_i32 : i32
    %184 = arith.extui %183 : i1 to i32
    %c0_i32_121 = arith.constant 0 : i32
    %185 = arith.cmpi ne, %184, %c0_i32_121 : i32
    scf.if %185 {
      %186 = arith.truncf %181 : vector<16x128xf32> to vector<16x128xbf16>
      %c0_122 = arith.constant 0 : index
      %c0_123 = arith.constant 0 : index
      %187 = vector.load %arg21[%c0_122, %c0_123] : memref<128x128xbf16, #tpu.memory_space<vmem>>, vector<128x128xbf16>
      %cst_124 = arith.constant dense<0.000000e+00> : vector<16x128xf32>
      %188 = tpu.matmul %186, %187, %cst_124 {dimension_numbers = #tpu.dot_dimension_numbers<[1], [0], [0], [1], [0, 0, 1, 1], [], []>} : vector<16x128xbf16>, vector<128x128xbf16>, vector<16x128xf32> -> vector<16x128xf32>
      %c0_125 = arith.constant 0 : index
      %c0_126 = arith.constant 0 : index
      %189 = vector.load %arg22[%c0_125, %c0_126] : memref<1x128xf32, #tpu.memory_space<vmem>>, vector<1x128xf32>
      %190 = vector.broadcast %189 : vector<1x128xf32> to vector<16x128xf32>
      %191 = arith.addf %188, %190 : vector<16x128xf32>
      %192 = math.tanh %191 : vector<16x128xf32>
      %193 = arith.truncf %192 : vector<16x128xf32> to vector<16x128xbf16>
      %c0_127 = arith.constant 0 : index
      %c0_128 = arith.constant 0 : index
      %194 = vector.load %arg23[%c0_127, %c0_128] : memref<128x128xbf16, #tpu.memory_space<vmem>>, vector<128x128xbf16>
      %cst_129 = arith.constant dense<0.000000e+00> : vector<16x128xf32>
      %195 = tpu.matmul %193, %194, %cst_129 {dimension_numbers = #tpu.dot_dimension_numbers<[1], [0], [0], [1], [0, 0, 1, 1], [], []>} : vector<16x128xbf16>, vector<128x128xbf16>, vector<16x128xf32> -> vector<16x128xf32>
      %c0_130 = arith.constant 0 : index
      %c0_131 = arith.constant 0 : index
      %196 = vector.load %arg24[%c0_130, %c0_131] : memref<1x128xf32, #tpu.memory_space<vmem>>, vector<1x128xf32>
      %197 = vector.broadcast %196 : vector<1x128xf32> to vector<16x128xf32>
      %198 = arith.addf %195, %197 : vector<16x128xf32>
      %c0_132 = arith.constant 0 : index
      %c0_133 = arith.constant 0 : index
      %199 = vector.load %arg25[%c0_132, %c0_133] : memref<16x128xf32, #tpu.memory_space<vmem>>, vector<16x128xf32>
      tpu.vector_store %arg25[%c0_132, %c0_133], %198 {strides = array<i32>} : memref<16x128xf32, #tpu.memory_space<vmem>>, vector<16x128xf32>,
    } else {
    }
    return
  }
  func.func @transform_0(%arg0: i32) -> (i32, i32) {
    %c0_i32 = arith.constant 0 : i32
    %c0_i32_0 = arith.constant 0 : i32
    %c0_i32_1 = arith.constant 0 : i32
    return %c0_i32, %c0_i32_0 : i32, i32
  }
  func.func @transform_1(%arg0: i32) -> (i32, i32) {
    %c0_i32 = arith.constant 0 : i32
    %c0_i32_0 = arith.constant 0 : i32
    %c0_i32_1 = arith.constant 0 : i32
    return %c0_i32, %c0_i32_0 : i32, i32
  }
  func.func @transform_2(%arg0: i32) -> (i32, i32) {
    %c0_i32 = arith.constant 0 : i32
    %c0_i32_0 = arith.constant 0 : i32
    %c0_i32_1 = arith.constant 0 : i32
    return %c0_i32, %c0_i32_0 : i32, i32
  }
  func.func @transform_3(%arg0: i32) -> (i32, i32) {
    %c0_i32 = arith.constant 0 : i32
    %c0_i32_0 = arith.constant 0 : i32
    %c0_i32_1 = arith.constant 0 : i32
    return %c0_i32, %c0_i32_0 : i32, i32
  }
  func.func @transform_4(%arg0: i32) -> (i32, i32, i32, i32) {
    %c0_i32 = arith.constant 0 : i32
    %c0_i32_0 = arith.constant 0 : i32
    %c0_i32_1 = arith.constant 0 : i32
    %c0_i32_2 = arith.constant 0 : i32
    return %arg0, %c0_i32, %c0_i32_0, %c0_i32_1 : i32, i32, i32, i32
  }
  func.func @transform_5(%arg0: i32) -> (i32, i32, i32, i32) {
    %c0_i32 = arith.constant 0 : i32
    %c0_i32_0 = arith.constant 0 : i32
    %c0_i32_1 = arith.constant 0 : i32
    %c0_i32_2 = arith.constant 0 : i32
    return %arg0, %c0_i32, %c0_i32_0, %c0_i32_1 : i32, i32, i32, i32
  }
  func.func @transform_6(%arg0: i32) -> (i32, i32, i32, i32) {
    %c0_i32 = arith.constant 0 : i32
    %c0_i32_0 = arith.constant 0 : i32
    %c0_i32_1 = arith.constant 0 : i32
    %c0_i32_2 = arith.constant 0 : i32
    return %arg0, %c0_i32, %c0_i32_0, %c0_i32_1 : i32, i32, i32, i32
  }
  func.func @transform_7(%arg0: i32) -> (i32, i32, i32, i32) {
    %c0_i32 = arith.constant 0 : i32
    %c0_i32_0 = arith.constant 0 : i32
    %c0_i32_1 = arith.constant 0 : i32
    %c0_i32_2 = arith.constant 0 : i32
    return %arg0, %c0_i32, %c0_i32_0, %c0_i32_1 : i32, i32, i32, i32
  }
  func.func @transform_8(%arg0: i32) -> (i32, i32, i32, i32) {
    %c0_i32 = arith.constant 0 : i32
    %c0_i32_0 = arith.constant 0 : i32
    %c0_i32_1 = arith.constant 0 : i32
    %c0_i32_2 = arith.constant 0 : i32
    return %arg0, %c0_i32, %c0_i32_0, %c0_i32_1 : i32, i32, i32, i32
  }
  func.func @transform_9(%arg0: i32) -> (i32, i32, i32, i32) {
    %c0_i32 = arith.constant 0 : i32
    %c0_i32_0 = arith.constant 0 : i32
    %c0_i32_1 = arith.constant 0 : i32
    %c0_i32_2 = arith.constant 0 : i32
    return %arg0, %c0_i32, %c0_i32_0, %c0_i32_1 : i32, i32, i32, i32
  }
  func.func @transform_10(%arg0: i32) -> (i32, i32, i32, i32) {
    %c0_i32 = arith.constant 0 : i32
    %c0_i32_0 = arith.constant 0 : i32
    %c0_i32_1 = arith.constant 0 : i32
    %c0_i32_2 = arith.constant 0 : i32
    return %arg0, %c0_i32, %c0_i32_0, %c0_i32_1 : i32, i32, i32, i32
  }
  func.func @transform_11(%arg0: i32) -> (i32, i32, i32) {
    %c0_i32 = arith.constant 0 : i32
    %c0_i32_0 = arith.constant 0 : i32
    %c0_i32_1 = arith.constant 0 : i32
    return %arg0, %c0_i32, %c0_i32_0 : i32, i32, i32
  }
  func.func @transform_12(%arg0: i32) -> (i32, i32, i32) {
    %c0_i32 = arith.constant 0 : i32
    %c0_i32_0 = arith.constant 0 : i32
    %c0_i32_1 = arith.constant 0 : i32
    return %arg0, %c0_i32, %c0_i32_0 : i32, i32, i32
  }
  func.func @transform_13(%arg0: i32) -> (i32, i32, i32) {
    %c0_i32 = arith.constant 0 : i32
    %c0_i32_0 = arith.constant 0 : i32
    %c0_i32_1 = arith.constant 0 : i32
    return %arg0, %c0_i32, %c0_i32_0 : i32, i32, i32
  }
  func.func @transform_14(%arg0: i32) -> (i32, i32, i32) {
    %c0_i32 = arith.constant 0 : i32
    %c0_i32_0 = arith.constant 0 : i32
    %c0_i32_1 = arith.constant 0 : i32
    return %arg0, %c0_i32, %c0_i32_0 : i32, i32, i32
  }
  func.func @transform_15(%arg0: i32) -> (i32, i32, i32) {
    %c0_i32 = arith.constant 0 : i32
    %c0_i32_0 = arith.constant 0 : i32
    %c0_i32_1 = arith.constant 0 : i32
    return %arg0, %c0_i32, %c0_i32_0 : i32, i32, i32
  }
  func.func @transform_16(%arg0: i32) -> (i32, i32, i32) {
    %c0_i32 = arith.constant 0 : i32
    %c0_i32_0 = arith.constant 0 : i32
    %c0_i32_1 = arith.constant 0 : i32
    return %arg0, %c0_i32, %c0_i32_0 : i32, i32, i32
  }
  func.func @transform_17(%arg0: i32) -> (i32, i32, i32) {
    %c0_i32 = arith.constant 0 : i32
    %c0_i32_0 = arith.constant 0 : i32
    %c0_i32_1 = arith.constant 0 : i32
    return %arg0, %c0_i32, %c0_i32_0 : i32, i32, i32
  }
  func.func @transform_18(%arg0: i32) -> (i32, i32, i32) {
    %c0_i32 = arith.constant 0 : i32
    %c0_i32_0 = arith.constant 0 : i32
    %c0_i32_1 = arith.constant 0 : i32
    return %arg0, %c0_i32, %c0_i32_0 : i32, i32, i32
  }
  func.func @transform_19(%arg0: i32) -> (i32, i32, i32) {
    %c0_i32 = arith.constant 0 : i32
    %c0_i32_0 = arith.constant 0 : i32
    %c0_i32_1 = arith.constant 0 : i32
    return %arg0, %c0_i32, %c0_i32_0 : i32, i32, i32
  }
  func.func @transform_20(%arg0: i32) -> (i32, i32) {
    %c0_i32 = arith.constant 0 : i32
    %c0_i32_0 = arith.constant 0 : i32
    %c0_i32_1 = arith.constant 0 : i32
    return %c0_i32, %c0_i32_0 : i32, i32
  }
  func.func @transform_21(%arg0: i32) -> (i32, i32) {
    %c0_i32 = arith.constant 0 : i32
    %c0_i32_0 = arith.constant 0 : i32
    %c0_i32_1 = arith.constant 0 : i32
    return %c0_i32, %c0_i32_0 : i32, i32
  }
  func.func @transform_22(%arg0: i32) -> (i32, i32) {
    %c0_i32 = arith.constant 0 : i32
    %c0_i32_0 = arith.constant 0 : i32
    %c0_i32_1 = arith.constant 0 : i32
    return %c0_i32, %c0_i32_0 : i32, i32
  }
  func.func @transform_23(%arg0: i32) -> (i32, i32) {
    %c0_i32 = arith.constant 0 : i32
    %c0_i32_0 = arith.constant 0 : i32
    %c0_i32_1 = arith.constant 0 : i32
    return %c0_i32, %c0_i32_0 : i32, i32
  }
  func.func @transform_24(%arg0: i32) -> (i32, i32) {
    %c0_i32 = arith.constant 0 : i32
    %c0_i32_0 = arith.constant 0 : i32
    %c0_i32_1 = arith.constant 0 : i32
    return %c0_i32, %c0_i32_0 : i32, i32
  }
}

</mosaic_0001>

<bundles_post_ra>
// kernel: sentiment_forward.1
= control target key start
LH: loop header
LB: loop body
LE: loop exit
PB: predicated region body
PF: predicated region fallthrough
CT: control target
= control target key end

     0   :  { %s4816_s0 = inlined_call_operand.vmem [shape: f32[16,128], index: 0, kind: input, shape index: {}]   ;;  %s4817_s1 = inlined_call_operand.vmem [shape: f32[16,16], index: 1, kind: input, shape index: {}]   ;;  %s4818_s2 = inlined_call_operand.vmem [shape: f32[1,128], index: 2, kind: input, shape index: {}]   ;;  %s4819_s3 = inlined_call_operand.vmem [shape: f32[1,128], index: 3, kind: input, shape index: {}]   ;;  %s4820_s4 = inlined_call_operand.vmem [shape: bf16[2,2,128,64], index: 4, kind: input, shape index: {}]   ;;  %s4821_s5 = inlined_call_operand.vmem [shape: f32[2,2,1,64], index: 5, kind: input, shape index: {}]   ;;  %s4822_s6 = inlined_call_operand.vmem [shape: bf16[2,2,128,64], index: 6, kind: input, shape index: {}]   ;;  %s4823_s7 = inlined_call_operand.vmem [shape: f32[2,2,1,64], index: 7, kind: input, shape index: {}]   ;;  %s4824_s8 = inlined_call_operand.vmem [shape: bf16[2,2,128,64], index: 8, kind: input, shape index: {}]   ;;  %s4825_s9 = inlined_call_operand.vmem [shape: f32[2,2,1,64], index: 9, kind: input, shape index: {}]   ;;  %s4826_s10 = inlined_call_operand.vmem [shape: bf16[2,2,64,128], index: 10, kind: input, shape index: {}]   ;;  %s4827_s11 = inlined_call_operand.vmem [shape: f32[2,1,128], index: 11, kind: input, shape index: {}]   ;;  %s4828_s12 = inlined_call_operand.vmem [shape: f32[2,1,128], index: 12, kind: input, shape index: {}]   ;;  %s4829_s13 = inlined_call_operand.vmem [shape: f32[2,1,128], index: 13, kind: input, shape index: {}]   ;;  %s4830_s14 = inlined_call_operand.vmem [shape: bf16[2,128,512], index: 14, kind: input, shape index: {}]   ;;  %s4831_s15 = inlined_call_operand.vmem [shape: f32[2,1,512], index: 15, kind: input, shape index: {}]   ;;  %s4832_s16 = inlined_call_operand.vmem [shape: bf16[2,512,128], index: 16, kind: input, shape index: {}]   ;;  %s4833_s17 = inlined_call_operand.vmem [shape: f32[2,1,128], index: 17, kind: input, shape index: {}]   ;;  %s4834_s18 = inlined_call_operand.vmem [shape: f32[2,1,128], index: 18, kind: input, shape index: {}]   ;;  %s4835_s19 = inlined_call_operand.vmem [shape: f32[2,1,128], index: 19, kind: input, shape index: {}]   ;;  %s4836_s20 = inlined_call_operand.vmem [shape: bf16[128,128], index: 20, kind: input, shape index: {}]   ;;  %s4837_s21 = inlined_call_operand.vmem [shape: f32[1,128], index: 21, kind: input, shape index: {}]   ;;  %s4838_s22 = inlined_call_operand.vmem [shape: bf16[128,128], index: 22, kind: input, shape index: {}]   ;;  %s4839_s23 = inlined_call_operand.vmem [shape: f32[1,128], index: 23, kind: input, shape index: {}]   ;;  %s4840_s24 = inlined_call_operand.vmem [shape: f32[16,128], index: 24, kind: output, shape index: {}]  }
   0x1   :  { %4851 = sst [smem:[#allocation8_spill]] %s4816_s0 }
   0x2   :  { %4852 = sst [smem:[#allocation9_spill]] %s4817_s1 }
   0x3   :  { %4853 = sst [smem:[#allocation10_spill]] %s4818_s2 }
   0x4   :  { %4854 = sst [smem:[#allocation11_spill]] %s4819_s3 }
   0x5   :  { %4855 = sst [smem:[#allocation12_spill]] %s4820_s4 }
   0x6   :  { %4856 = sst [smem:[#allocation13_spill]] %s4821_s5  ;;  %s4285_s5 = smov 0  }
   0x7   :  { %4857 = sst [smem:[#allocation14_spill]] %s4822_s6 }
   0x8   :  { %4858 = sst [smem:[#allocation15_spill]] %s4823_s7 }
   0x9   :  { %4859 = sst [smem:[#allocation16_spill]] %s4824_s8 }
   0xa   :  { %4860 = sst [smem:[#allocation17_spill]] %s4825_s9 }
   0xb   :  { %4861 = sst [smem:[#allocation18_spill]] %s4826_s10 }
   0xc   :  { %4862 = sst [smem:[#allocation19_spill]] %s4830_s14 }
   0xd   :  { %4863 = sst [smem:[#allocation20_spill]] %s4836_s20 }
   0xe   :  { %4864 = sst [smem:[#allocation21_spill]] %s4837_s21 }
   0xf   :  { %4865 = sst [smem:[#allocation22_spill]] %s4838_s22 }
  0x10   :  { %4866 = sst [smem:[#allocation23_spill]] %s4839_s23 }
  0x11   :  { %4867 = sst [smem:[#allocation24_spill]] %s4840_s24 }
  0x12 LB: > { %4868 = sst [smem:[#allocation3_spill]] %s4153_s5  ;;  %s4291_s26 = sadd.s32 4294967295, %s4153_s5   ;;  %s4153_s5 = sphi %s4285_s5, %s34_s5  }
  0x13   : > { %p3348_p0 = scmp.ge.s32.totalorder %s4153_s5, 1  ;;  %p791_p1 = scmp.lt.s32.totalorder %s4153_s5, 3 }
  0x15   : > { %p792_p2 = pnand %p3348_p0, %p791_p1 }
  0x17   : > { %795 = sbr.rel (%p792_p2) target bundleno = 3932 (0xf5c), region = 116 }
  0x1e   : > { %p911_p3 = scmp.lt.s32.totalorder %s4291_s26, 1  ;;  %s4869_s0 = sld [smem:[#allocation12_spill]] }
  0x1f   : > { %s4871_s25 = sld [smem:[#allocation13_spill]]  ;;  %s4873_s5 = sld [smem:[#allocation14_spill]] }
  0x20   : > { %s4297_s27 = scalar_select %p911_p3, %s4291_s26, 1 }
  0x21   : > { %s4875_s22 = sld [smem:[#allocation15_spill]]  ;;  %s4878_s9 = sld [smem:[#allocation17_spill]] }
  0x22   : > { %s3586_s28 = sshll.u32 %s4297_s27, 7  ;;  %s3351_s6 = sshll.u32 %s4297_s27, 1 }
  0x23   : > { %s3589_s4 = sshll.u32 %s4297_s27, 6  ;;  %s4879_s10 = sld [smem:[#allocation18_spill]] }
  0x24   : > { %s4304_s7 = scalar_lea.vmem %s4869_s0, %s3586_s28  ;;  %s4877_s0 = sld [smem:[#allocation16_spill]] }
  0x25   : > { %4870 = sst [smem:[#allocation4_spill]] %s4304_s7  ;;  %s4309_s8 = scalar_lea.vmem %s4871_s25, %s3351_s6 }
  0x26   : > { %4872 = sst [smem:[#allocation5_spill]] %s4309_s8  ;;  %s4314_s24 = scalar_lea.vmem %s4873_s5, %s3586_s28 }
  0x27   : > { %4874 = sst [smem:[#allocation6_spill]] %s4314_s24  ;;  %s4319_s20 = scalar_lea.vmem %s4875_s22, %s3351_s6 }
  0x28   : > { %4876 = sst [smem:[#allocation7_spill]] %s4319_s20  ;;  %s4329_s25 = scalar_lea.vmem %s4878_s9, %s3351_s6 }
  0x29   : > { %s4339_s22 = scalar_lea.vmem %s4879_s10, %s3589_s4  ;;  %s3590_s6 = sshll.u32 %s4297_s27, 8 }
  0x2a   : > { %s4324_s7 = scalar_lea.vmem %s4877_s0, %s3586_s28  ;;  %s4880_s14 = sld [smem:[#allocation19_spill]] }
  0x2b   : > { %s3362_s1 = sshll.u32 %s4297_s27, 2  ;;  %s4364_s20 = scalar_lea.vmem %s4832_s16, %s3590_s6 }
  0x2c   : > { %s4359_s24 = scalar_lea.vmem %s4831_s15, %s3362_s1  ;;  %s968_s29 = scalar_lea.vmem %s4833_s17, %s4297_s27 }
  0x2d   : > { %s971_s30 = scalar_lea.vmem %s4834_s18, %s4297_s27  ;;  %p3365_p4 = scmp.ne.s32.totalorder %s4291_s26, 0 }
  0x2e   : > { %s4881_s5 = sld [smem:[#allocation8_spill]] (!%p3365_p4)  ;;  %s4883_s0 = sld [smem:[#allocation10_spill]] (!%p3365_p4) }
  0x2f   : > { %979 = sbr.rel (%p3365_p4) target bundleno = 369 (0x171), region = 120  ;;  %s4884_s3 = sld [smem:[#allocation11_spill]] (!%p3365_p4) }
  0x30   : > { %s4353_s9 = scalar_lea.vmem %s4880_s14, %s3590_s6  ;;  %s974_s14 = scalar_lea.vmem %s4835_s19, %s4297_s27 }
  0x34   : > { %s4882_s4 = smov (!%p3365_p4), %s4881_s5  ;;  %v980_v0 = vld [vmem:[%s4881_s5] sm:$0xff] (!%p3365_p4) }
  0x35   : > { %984 = vadd.xlane.f32.xlu0 (!%p3365_p4), %v980_v0  ;;  %v981_v1 = vld [vmem:[%s4882_s4 + $0x8] sm:$0xff] (!%p3365_p4)  ;;  %v3366_v17 = vld [vmem:[%s4883_s0] ss:$0 sm:$0xff] (!%p3365_p4) }
  0x36   : > { %v3367_v19 = vld [vmem:[%s4884_s3] ss:$0 sm:$0xff] }
  0x39   : > { %986 = vadd.xlane.f32.xlu0 %v981_v1 }
  0xc2   : > { %v985_v2 = vpop.xlane.xlu0 %984 }
  0xc3   : > { %v989_v3 = vmul.f32 0.0078125, %v985_v2 }
  0xc5   : > { %v991_v4 = vsub.f32 %v980_v0, %v989_v3 }
  0xc6   : > { %v987_v5 = vpop.xlane.xlu0 %986 }
  0xc7   : > { %v990_v6 = vmul.f32 0.0078125, %v987_v5  ;;  %v993_v7 = vmul.f32 %v991_v4, %v991_v4 }
  0xc9   : > { %v992_v8 = vsub.f32 %v981_v1, %v990_v6  ;;  %995 = vadd.xlane.f32.xlu1 %v993_v7 }
  0xcb   : > { %v994_v9 = vmul.f32 %v992_v8, %v992_v8 }
  0xcd   : > { %997 = vadd.xlane.f32.xlu1 %v994_v9 }
 0x156   : > { %v996_v10 = vpop.xlane.xlu1 %995 }
 0x157   : > { %v999_v11 = vmul.f32 0.0078125, %v996_v10 }
 0x159   : > { %v1001_v12 = vadd.f32 1e-12, %v999_v11 }
 0x15a   : > { %v998_v13 = vpop.xlane.xlu1 %997 }
 0x15b   : > { %3947 = vrsqrt.f32 %v1001_v12  ;;  %v1000_v14 = vmul.f32 0.0078125, %v998_v13 }
 0x15d   : > { %v1002_v15 = vadd.f32 1e-12, %v1000_v14 }
 0x15f   : > { %3949 = vrsqrt.f32 %v1002_v15 }
 0x165   : > { %v3948_v16 = vpop.eup %3947 }
 0x166   : > { %v1005_v18 = vmul.f32 %v3948_v16, %v991_v4 }
 0x168   : > { %v1013_v20 = vmul.f32 %v3366_v17, %v1005_v18 }
 0x169   : > { %v3950_v21 = vpop.eup %3949 }
 0x16a   : > { %v1021_v22 = vadd.f32 %v3367_v19, %v1013_v20  ;;  %v1006_v23 = vmul.f32 %v3950_v21, %v992_v8 }
 0x16c   : > { %1023 = vst [vmem:[#allocation2] sm:$0xff] %v1021_v22  ;;  %v1014_v24 = vmul.f32 %v3366_v17, %v1006_v23 }
 0x16e   : > { %v1022_v25 = vadd.f32 %v3367_v19, %v1014_v24 }
 0x170   : > { %1024 = vst [vmem:[#allocation2 + $0x8] sm:$0xff] %v1022_v25 }
 0x171 PF: > { %s4885_s8 = sld [smem:[#allocation6_spill]]  ;;  %s4886_s1 = sld [smem:[#allocation4_spill]]  ;;  %v4155_v27 = vmov 0.0   ;;  %vm4156_vm0 = vmmov 0   ;;  %vm1370_vm1 = vcmask 523264   ;;  %v3967_v1 = vld [vmem:[%s4324_s7] sm:$0xff]  }
 0x172   : > { %3746 = vmatprep.subr.bf16.mxu1 %v4155_v27  ;;  %3726 = vmatprep.subr.bf16.mxu0 %v4155_v27  ;;  %s4887_s5 = sld [smem:[#allocation5_spill]]  ;;  %s4888_s6 = sld [smem:[#allocation7_spill]]  ;;  %v3968_v2 = vld [vmem:[%s4324_s7 + $0x8] sm:$0xff]   ;;  %v3969_v3 = vld [vmem:[%s4324_s7 + $0x10] sm:$0xff]   ;;  %v3970_v4 = vld [vmem:[%s4324_s7 + $0x18] sm:$0xff]   ;;  %vm1418_vm2 = vcmask 130048  }
 0x173   : > { %3762 = vmatprep.mubr.msk.bf16.mxu1 %vm4156_vm0, %v4155_v27  ;;  %3742 = vmatprep.mubr.msk.bf16.mxu0 %vm4156_vm0, %v4155_v27  ;;  %v4424_v42 = vld [vmem:[#allocation2] sm:$0xff]  ;;  %v3972_v6 = vld [vmem:[%s4324_s7 + $0x28] sm:$0xff]   ;;  %v3973_v7 = vld [vmem:[%s4324_s7 + $0x30] sm:$0xff]   ;;  %s4889_s28 = sld [smem:[#allocation9_spill]]  ;;  %s4890_s2 = scalar_lea.vmem %s4827_s11, %s4297_s27 }
 0x174   : > { %v3971_v5 = vld [vmem:[%s4324_s7 + $0x20] sm:$0xff]   ;;  %v3974_v8 = vld [vmem:[%s4324_s7 + $0x38] sm:$0xff]   ;;  %s4891_s3 = scalar_lea.vmem %s4828_s12, %s4297_s27  ;;  %p3565_p5 = scmp.ne.s32.totalorder %s4291_s26, 1 }
 0x175   : > { %vm4159_vm3 = vmmov (!%p3565_p5), 0   ;;  %s4896_s10 = sld [smem:[#allocation23_spill]] (!%p3565_p5) }
 0x177   : > { %v3951_v26 = vld [vmem:[%s4885_s8] sm:$0xff]   ;;  %v3953_v29 = vld [vmem:[%s4885_s8 + $0x8] sm:$0xff]   ;;  %v3955_v31 = vld [vmem:[%s4885_s8 + $0x10] sm:$0xff]  }
 0x178   : > { %v3952_v28 = vld [vmem:[%s4886_s1] sm:$0xff]   ;;  %3747 = vmatpush3.bf16.msra.mxu1 %v3951_v26  ;;  %v3954_v30 = vld [vmem:[%s4886_s1 + $0x8] sm:$0xff]   ;;  %v3956_v32 = vld [vmem:[%s4886_s1 + $0x10] sm:$0xff]  }
 0x179   : > { %3748 = vmatprep.subr.bf16.mxu1 %v4155_v27  ;;  %3727 = vmatpush3.bf16.msra.mxu0 %v3952_v28  ;;  %v3957_v33 = vld [vmem:[%s4885_s8 + $0x18] sm:$0xff]   ;;  %v3959_v35 = vld [vmem:[%s4885_s8 + $0x20] sm:$0xff]   ;;  %v3961_v37 = vld [vmem:[%s4885_s8 + $0x28] sm:$0xff]  }
 0x17a   : > { %3728 = vmatprep.subr.bf16.mxu0 %v4155_v27  ;;  %v3958_v34 = vld [vmem:[%s4886_s1 + $0x18] sm:$0xff]   ;;  %v3960_v36 = vld [vmem:[%s4886_s1 + $0x20] sm:$0xff]   ;;  %v3962_v38 = vld [vmem:[%s4886_s1 + $0x28] sm:$0xff]  }
 0x17b   : > { %v3963_v39 = vld [vmem:[%s4885_s8 + $0x30] sm:$0xff]   ;;  %v3965_v41 = vld [vmem:[%s4885_s8 + $0x38] sm:$0xff]   ;;  %v4426_v43 = vld [vmem:[#allocation2 + $0x8] sm:$0xff] }
 0x17c   : > { %3749 = vmatpush3.bf16.msra.mxu1 %v3953_v29  ;;  %v3964_v40 = vld [vmem:[%s4886_s1 + $0x30] sm:$0xff]   ;;  %v3966_v44 = vld [vmem:[%s4886_s1 + $0x38] sm:$0xff]   ;;  %v4433_v45 = vpack.c.bf16 %v4426_v43, %v4424_v42  ;;  %v3368_v46 = vld [vmem:[%s4887_s5] ss:$0 sm:$0xff] }
 0x17d   : > { %3750 = vmatprep.subr.bf16.mxu1 %v4155_v27  ;;  %3729 = vmatpush3.bf16.msra.mxu0 %v3954_v30  ;;  %v3377_v47 = vld [vmem:[%s4888_s6] ss:$0 sm:$0xff]  ;;  %v4477_v11 = vld [vmem:[%s4889_s28 + $0x8] sm:$0xff] }
 0x17e   : > { %3730 = vmatprep.subr.bf16.mxu0 %v4155_v27  ;;  %v4472_v9 = vld [vmem:[%s4889_s28] sm:$0xff] }
 0x180   : > { %3751 = vmatpush3.bf16.msra.mxu1 %v3955_v31 }
 0x181   : > { %3752 = vmatprep.subr.bf16.mxu1 %v4155_v27  ;;  %3731 = vmatpush3.bf16.msra.mxu0 %v3956_v32 }
 0x182   : > { %3732 = vmatprep.subr.bf16.mxu0 %v4155_v27 }
 0x184   : > { %3753 = vmatpush3.bf16.msra.mxu1 %v3957_v33  ;;  %v3386_v33 = vld [vmem:[%s4329_s25] ss:$0 sm:$0xff] }
 0x185   : > { %3754 = vmatprep.subr.bf16.mxu1 %v4155_v27  ;;  %3733 = vmatpush3.bf16.msra.mxu0 %v3958_v34 }
 0x186   : > { %3734 = vmatprep.subr.bf16.mxu0 %v4155_v27 }
 0x188   : > { %3755 = vmatpush3.bf16.msra.mxu1 %v3959_v35  ;;  %v3975_v35 = vld [vmem:[%s4885_s8 + $0x40] sm:$0xff]  }
 0x189   : > { %3756 = vmatprep.subr.bf16.mxu1 %v4155_v27  ;;  %3735 = vmatpush3.bf16.msra.mxu0 %v3960_v36 }
 0x18a   : > { %3736 = vmatprep.subr.bf16.mxu0 %v4155_v27 }
 0x18c   : > { %3757 = vmatpush3.bf16.msra.mxu1 %v3961_v37 }
 0x18d   : > { %3758 = vmatprep.subr.bf16.mxu1 %v4155_v27  ;;  %3737 = vmatpush3.bf16.msra.mxu0 %v3962_v38 }
 0x18e   : > { %3738 = vmatprep.subr.bf16.mxu0 %v4155_v27 }
 0x190   : > { %3759 = vmatpush3.bf16.msra.mxu1 %v3963_v39  ;;  %v3976_v39 = vld [vmem:[%s4885_s8 + $0x48] sm:$0xff]  }
 0x191   : > { %3760 = vmatprep.subr.bf16.mxu1 %v4155_v27  ;;  %3739 = vmatpush3.bf16.msra.mxu0 %v3964_v40  ;;  %v3977_v40 = vld [vmem:[%s4885_s8 + $0x50] sm:$0xff]  }
 0x192   : > { %3740 = vmatprep.subr.bf16.mxu0 %v4155_v27 }
 0x194   : > { %3761 = vmatpush3.bf16.msra.mxu1 %v3965_v41  ;;  %v3979_v41 = vld [vmem:[%s4885_s8 + $0x58] sm:$0xff]  }
 0x195   : > { %3741 = vmatpush3.bf16.msra.mxu0 %v3966_v44  ;;  %3786 = vmatprep.subr.bf16.mxu1 %v4155_v27  ;;  %v3981_v44 = vld [vmem:[%s4885_s8 + $0x60] sm:$0xff]  }
 0x196   : > { %3766 = vmatprep.subr.bf16.mxu0 %v4155_v27 }
 0x197   : > { %3763 = vmatmul.mubr.bf16.vlgmr.msra.gmra.mrb[0].mxu1 %v4433_v45 }
 0x198   : > { %3743 = vmatmul.mubr.bf16.vlgmr.msra.gmra.mrb[0].mxu0 %v4433_v45  ;;  %3788 = vmatprep.mubr.msk.bf16.mxu1 %vm4156_vm0, %v4155_v27 }
 0x199   : > { %3782 = vmatprep.mubr.msk.bf16.mxu0 %vm4156_vm0, %v4155_v27  ;;  %3767 = vmatpush3.bf16.msra.mxu0 %v3967_v1  ;;  %v3992_v1 = vld [vmem:[%s4324_s7 + $0x48] sm:$0xff]  }
 0x19a   : > { %3768 = vmatprep.subr.bf16.mxu0 %v4155_v27 }
 0x19d   : > { %3769 = vmatpush3.bf16.msra.mxu0 %v3968_v2  ;;  %v3993_v2 = vld [vmem:[%s4324_s7 + $0x50] sm:$0xff]  }
 0x19e   : > { %3770 = vmatprep.subr.bf16.mxu0 %v4155_v27 }
 0x1a1   : > { %3771 = vmatpush3.bf16.msra.mxu0 %v3969_v3  ;;  %v3994_v3 = vld [vmem:[%s4324_s7 + $0x58] sm:$0xff]  }
 0x1a2   : > { %3772 = vmatprep.subr.bf16.mxu0 %v4155_v27 }
 0x1a5   : > { %3773 = vmatpush3.bf16.msra.mxu0 %v3970_v4  ;;  %v3995_v4 = vld [vmem:[%s4324_s7 + $0x60] sm:$0xff]  }
 0x1a6   : > { %3774 = vmatprep.subr.bf16.mxu0 %v4155_v27 }
 0x1a9   : > { %3775 = vmatpush3.bf16.msra.mxu0 %v3971_v5  ;;  %v3996_v5 = vld [vmem:[%s4324_s7 + $0x68] sm:$0xff]  }
 0x1aa   : > { %3776 = vmatprep.subr.bf16.mxu0 %v4155_v27 }
 0x1ad   : > { %3777 = vmatpush3.bf16.msra.mxu0 %v3972_v6  ;;  %v3997_v6 = vld [vmem:[%s4324_s7 + $0x70] sm:$0xff]  }
 0x1ae   : > { %3778 = vmatprep.subr.bf16.mxu0 %v4155_v27 }
 0x1b1   : > { %3779 = vmatpush3.bf16.msra.mxu0 %v3973_v7  ;;  %v3998_v7 = vld [vmem:[%s4324_s7 + $0x78] sm:$0xff]  }
 0x1b2   : > { %3780 = vmatprep.subr.bf16.mxu0 %v4155_v27 }
 0x1b5   : > { %3781 = vmatpush3.bf16.msra.mxu0 %v3974_v8  ;;  %v3999_v8 = vld [vmem:[%s4339_s22] sm:$0xff]  }
 0x1b6   : > { %3818 = vmatprep.subr.bf16.mxu0 %v4155_v27 }
 0x1b8   : > { %3783 = vmatmul.mubr.bf16.vlgmr.msra.gmra.mrb[4].mxu0 %v4433_v45 }
 0x1b9   : > { %3834 = vmatprep.mubr.msk.bf16.mxu0 %vm4156_vm0, %v4155_v27  ;;  %3819 = vmatpush3.bf16.msra.mxu0 %v3975_v35 }
 0x1ba   : > { %3820 = vmatprep.subr.bf16.mxu0 %v4155_v27 }
 0x1bd   : > { %3821 = vmatpush3.bf16.msra.mxu0 %v3976_v39 }
 0x1be   : > { %3822 = vmatprep.subr.bf16.mxu0 %v4155_v27 }
 0x1c1   : > { %3823 = vmatpush3.bf16.msra.mxu0 %v3977_v40 }
 0x1c2   : > { %3824 = vmatprep.subr.bf16.mxu0 %v4155_v27 }
 0x1c5   : > { %3825 = vmatpush3.bf16.msra.mxu0 %v3979_v41 }
 0x1c6   : > { %3826 = vmatprep.subr.bf16.mxu0 %v4155_v27 }
 0x1c9   : > { %3827 = vmatpush3.bf16.msra.mxu0 %v3981_v44 }
 0x1ca   : > { %3828 = vmatprep.subr.bf16.mxu0 %v4155_v27 }
 0x26a   : > { %v1249_v48 = vpop.f32.mrb[0].mxu1 }
 0x26b   : > { %v3764_v49 = vpop.f32.mrb[1].mxu1  ;;  %v1135_v50 = vpop.f32.mrb[0].mxu0  ;;  %v1250_v54 = vadd.f32 %v3377_v47, %v1249_v48  ;;  %v3987_v48 = vld [vmem:[%s4885_s8 + $0x78] sm:$0xff]  }
 0x26c   : > { %v1252_v51 = vpop.f32.mrb[2].mxu1  ;;  %v1136_v52 = vadd.f32 %v3368_v46, %v1135_v50  ;;  %v3744_v53 = vpop.f32.mrb[1].mxu0 }
 0x26d   : > { %v1253_v55 = vadd.f32 %v3377_v47, %v1252_v51  ;;  %v3765_v56 = vpop.f32.mrb[3].mxu1  ;;  %v1138_v57 = vpop.f32.mrb[2].mxu0  ;;  %v3985_v47 = vld [vmem:[%s4885_s8 + $0x70] sm:$0xff]  }
 0x26e   : > { %v1142_v58 = vmul.f32 0.125, %v1136_v52  ;;  %v1139_v59 = vadd.f32 %v3368_v46, %v1138_v57  ;;  %v3745_v60 = vpop.f32.mrb[3].mxu0  ;;  %v3983_v46 = vld [vmem:[%s4885_s8 + $0x68] sm:$0xff]  }
 0x26f   : > { %v1369_v61 = vpack.c.bf16 %v1253_v55, %v1250_v54  ;;  %3829 = vmatpush3.bf16.msra.mxu0 %v3983_v46  ;;  %v3978_v55 = vld [vmem:[%s4886_s1 + $0x40] sm:$0xff]   ;;  %v3980_v57 = vld [vmem:[%s4886_s1 + $0x48] sm:$0xff]  }
 0x270   : > { %v1143_v62 = vmul.f32 0.125, %v1139_v59  ;;  %3830 = vmatprep.subr.bf16.mxu0 %v4155_v27  ;;  %v3984_v59 = vld [vmem:[%s4886_s1 + $0x58] sm:$0xff]   ;;  %v3986_v60 = vld [vmem:[%s4886_s1 + $0x60] sm:$0xff]  }
 0x271   : > { %v1375_v63 = vsel %vm1370_vm1, %v1369_v61, 0  ;;  %v3988_v61 = vld [vmem:[%s4886_s1 + $0x68] sm:$0xff]  }
 0x272   : > { %v1368_v0 = vpack.c.bf16 %v1143_v62, %v1142_v58  ;;  %3787 = vmatpush3.bf16.xpose.msra.mxu1 %v1375_v63  ;;  %v3982_v58 = vld [vmem:[%s4886_s1 + $0x50] sm:$0xff]   ;;  %v3990_v63 = vld [vmem:[%s4886_s1 + $0x78] sm:$0xff]  }
 0x273   : > { %3792 = vmatprep.subr.bf16.mxu1 %v4155_v27  ;;  %3831 = vmatpush3.bf16.msra.mxu0 %v3985_v47  ;;  %v3989_v62 = vld [vmem:[%s4886_s1 + $0x70] sm:$0xff]  }
 0x274   : > { %3832 = vmatprep.subr.bf16.mxu0 %v4155_v27 }
 0x277   : > { %3833 = vmatpush3.bf16.msra.mxu0 %v3987_v48 }
 0x278   : > { %3858 = vmatprep.subr.bf16.mxu0 %v4155_v27 }
 0x279   : > { %3789 = vmatmul.mubr.msk.bf16.vlgmr.msra.gmra.mrb[4].mxu1 %vm1370_vm1, %v1368_v0  ;;  %v3991_v0 = vld [vmem:[%s4324_s7 + $0x40] sm:$0xff]  }
 0x27a   : > { %3794 = vmatprep.mubr.msk.bf16.mxu1 %vm4156_vm0, %v4155_v27  ;;  %3835 = vmatmul.mubr.bf16.vlgmr.msra.gmra.mrb[8].mxu0 %v4433_v45 }
 0x27b   : > { %3860 = vmatprep.mubr.msk.bf16.mxu0 %vm4156_vm0, %v4155_v27 }
 0x28b   : > { %v1361_v30 = vpop.f32.mrb[4].mxu0 }
 0x28c   : > { %v3784_v31 = vpop.f32.mrb[5].mxu0  ;;  %v1362_v36 = vadd.f32 %v3386_v33, %v1361_v30 }
 0x28d   : > { %v1364_v32 = vpop.f32.mrb[6].mxu0 }
 0x28e   : > { %v3785_v34 = vpop.f32.mrb[7].mxu0  ;;  %v1365_v37 = vadd.f32 %v3386_v33, %v1364_v32 }
 0x290   : > { %v1442_v38 = vpack.c.bf16 %v1365_v37, %v1362_v36 }
 0x292   : > { %3793 = vmatpush3.bf16.msra.mxu1 %v1442_v38  ;;  %v3466_v38 = vld [vmem:[%s4329_s25 + $0x1] ss:$0 sm:$0xff] }
 0x293   : > { %3798 = vmatprep.subr.bf16.mxu1 %v4155_v27 }
 0x34c   : > { %v1411_v10 = vpop.f32.mrb[4].mxu1 }
 0x34d   : > { %v1412_v12 = vadd.f32 %v1411_v10, %v4472_v9  ;;  %v3790_v13 = vpop.f32.mrb[5].mxu1  ;;  %v4000_v10 = vld [vmem:[%s4339_s22 + $0x8] sm:$0xff]  }
 0x34e   : > { %v1414_v14 = vpop.f32.mrb[6].mxu1  ;;  %v4002_v13 = vld [vmem:[%s4339_s22 + $0x18] sm:$0xff]  }
 0x34f   : > { %v1415_v15 = vadd.f32 %v1414_v14, %v4477_v11  ;;  %v3791_v16 = vpop.f32.mrb[7].mxu1  ;;  %v1419_v17 = vsel %vm1418_vm2, %v1412_v12, -inf  ;;  %v3440_v14 = vld [vmem:[%s4888_s6 + $0x1] ss:$0 sm:$0xff] }
 0x350   : > { %1420 = vmax.xlane.f32.xlu0 %v1419_v17 }
 0x351   : > { %v1422_v18 = vsel %vm1418_vm2, %v1415_v15, -inf }
 0x354   : > { %1423 = vmax.xlane.f32.xlu0 %v1422_v18 }
 0x3dd   : > { %v1421_v19 = vpop.xlane.xlu0 %1420 }
 0x3de   : > { %v1425_v20 = vsub.f32 %v1412_v12, %v1421_v19  ;;  %v4001_v12 = vld [vmem:[%s4339_s22 + $0x10] sm:$0xff]  }
 0x3e0   : > { %v1427_v21 = vmul.f32 1.442695, %v1425_v20 }
 0x3e1   : > { %v1424_v22 = vpop.xlane.xlu0 %1423 }
 0x3e2   : > { %4087 = vpow2.f32 %v1427_v21  ;;  %v1426_v23 = vsub.f32 %v1415_v15, %v1424_v22  ;;  %v1719_v15 = vpop.f32.mrb[8].mxu0 }
 0x3e3   : > { %v3836_v16 = vpop.f32.mrb[9].mxu0 }
 0x3e4   : > { %v1429_v24 = vmul.f32 1.442695, %v1426_v23  ;;  %v1722_v17 = vpop.f32.mrb[10].mxu0  ;;  %v4006_v16 = vld [vmem:[%s4339_s22 + $0x38] sm:$0xff]  }
 0x3e5   : > { %v1723_v18 = vadd.f32 %v3440_v14, %v1722_v17  ;;  %v3837_v19 = vpop.f32.mrb[11].mxu0 }
 0x3e6   : > { %4089 = vpow2.f32 %v1429_v24 }
 0x3ec   : > { %v4088_v25 = vpop.eup %4087 }
 0x3ed   : > { %v1431_v26 = vsel %vm1418_vm2, %v4088_v25, 0.0 }
 0x3ee   : > { %1432 = vadd.xlane.f32.xlu1 %v1431_v26 }
 0x3f0   : > { %v4090_v28 = vpop.eup %4089 }
 0x3f1   : > { %v1434_v29 = vsel %vm1418_vm2, %v4090_v28, 0.0 }
 0x3f2   : > { %1435 = vadd.xlane.f32.xlu1 %v1434_v29 }
 0x47b   : > { %v1433_v49 = vpop.xlane.xlu1 %1432 }
 0x47c   : > { %4091 = vrcp.f32 %v1433_v49 }
 0x47f   : > { %v1436_v50 = vpop.xlane.xlu1 %1435 }
 0x480   : > { %4093 = vrcp.f32 %v1436_v50 }
 0x486   : > { %v4092_v51 = vpop.eup %4091 }
 0x487   : > { %v1439_v53 = vmul.f32 %v4092_v51, %v4088_v25 }
 0x48a   : > { %v4094_v52 = vpop.eup %4093 }
 0x48b   : > { %v1440_v54 = vmul.f32 %v4094_v52, %v4090_v28  ;;  %v3414_v28 = vld [vmem:[%s4887_s5 + $0x1] ss:$0 sm:$0xff]  ;;  %s4892_s5 = scalar_lea.vmem %s4829_s13, %s4297_s27  ;;  %s4897_s27 = sld [smem:[#allocation24_spill]] (!%p3565_p5) }
 0x48d   : > { %v1441_v56 = vpack.c.bf16 %v1440_v54, %v1439_v53 }
 0x48f   : > { %3795 = vmatmul.mubr.msk.bf16.vlgmr.msra.gmra.mrb[8].mxu1 %vm1418_vm2, %v1441_v56 }
 0x490   : > { %3799 = vmatpush3.bf16.msra.mxu1 %v3978_v55  ;;  %3814 = vmatprep.mubr.msk.bf16.mxu1 %vm4156_vm0, %v4155_v27 }
 0x491   : > { %3800 = vmatprep.subr.bf16.mxu1 %v4155_v27 }
 0x494   : > { %3801 = vmatpush3.bf16.msra.mxu1 %v3980_v57 }
 0x495   : > { %3802 = vmatprep.subr.bf16.mxu1 %v4155_v27 }
 0x498   : > { %3803 = vmatpush3.bf16.msra.mxu1 %v3982_v58 }
 0x499   : > { %3804 = vmatprep.subr.bf16.mxu1 %v4155_v27 }
 0x49c   : > { %3805 = vmatpush3.bf16.msra.mxu1 %v3984_v59 }
 0x49d   : > { %3806 = vmatprep.subr.bf16.mxu1 %v4155_v27 }
 0x4a0   : > { %3807 = vmatpush3.bf16.msra.mxu1 %v3986_v60 }
 0x4a1   : > { %3808 = vmatprep.subr.bf16.mxu1 %v4155_v27 }
 0x4a4   : > { %3809 = vmatpush3.bf16.msra.mxu1 %v3988_v61 }
 0x4a5   : > { %3810 = vmatprep.subr.bf16.mxu1 %v4155_v27 }
 0x4a8   : > { %3811 = vmatpush3.bf16.msra.mxu1 %v3989_v62 }
 0x4a9   : > { %3812 = vmatprep.subr.bf16.mxu1 %v4155_v27 }
 0x4ac   : > { %3813 = vmatpush3.bf16.msra.mxu1 %v3990_v63 }
 0x4ad   : > { %3838 = vmatprep.subr.bf16.mxu1 %v4155_v27 }
 0x4af   : > { %3815 = vmatmul.mubr.bf16.vlgmr.msra.gmra.mrb[12].mxu1 %v4433_v45 }
 0x4b0   : > { %3839 = vmatpush3.bf16.msra.mxu1 %v3991_v0  ;;  %3854 = vmatprep.mubr.msk.bf16.mxu1 %vm4156_vm0, %v4155_v27 }
 0x4b1   : > { %3840 = vmatprep.subr.bf16.mxu1 %v4155_v27 }
 0x4b4   : > { %3841 = vmatpush3.bf16.msra.mxu1 %v3992_v1 }
 0x4b5   : > { %3842 = vmatprep.subr.bf16.mxu1 %v4155_v27 }
 0x4b8   : > { %3843 = vmatpush3.bf16.msra.mxu1 %v3993_v2 }
 0x4b9   : > { %3844 = vmatprep.subr.bf16.mxu1 %v4155_v27 }
 0x4bc   : > { %3845 = vmatpush3.bf16.msra.mxu1 %v3994_v3 }
 0x4bd   : > { %3846 = vmatprep.subr.bf16.mxu1 %v4155_v27 }
 0x4c0   : > { %3847 = vmatpush3.bf16.msra.mxu1 %v3995_v4 }
 0x4c1   : > { %3848 = vmatprep.subr.bf16.mxu1 %v4155_v27 }
 0x4c4   : > { %3849 = vmatpush3.bf16.msra.mxu1 %v3996_v5 }
 0x4c5   : > { %3850 = vmatprep.subr.bf16.mxu1 %v4155_v27 }
 0x4c8   : > { %3851 = vmatpush3.bf16.msra.mxu1 %v3997_v6 }
 0x4c9   : > { %3852 = vmatprep.subr.bf16.mxu1 %v4155_v27 }
 0x4cc   : > { %3853 = vmatpush3.bf16.msra.mxu1 %v3998_v7 }
 0x4cd   : > { %3882 = vmatprep.subr.bf16.mxu1 %v4155_v27 }
 0x4cf   : > { %3855 = vmatmul.mubr.bf16.vlgmr.msra.gmra.mrb[16].mxu1 %v4433_v45  ;;  %v1720_v45 = vadd.f32 %v3440_v14, %v1719_v15  ;;  %v4004_v15 = vld [vmem:[%s4339_s22 + $0x28] sm:$0xff]  }
 0x4d0   : > { %3883 = vmatpush3.bf16.msra.mxu1 %v3999_v8  ;;  %3890 = vmatprep.mubr.msk.bf16.mxu1 %vm4156_vm0, %v4155_v27 }
 0x4d1   : > { %3884 = vmatprep.subr.bf16.mxu1 %v4155_v27  ;;  %v1841_v20 = vpack.c.bf16 %v1723_v18, %v1720_v45  ;;  %v4005_v45 = vld [vmem:[%s4339_s22 + $0x30] sm:$0xff]  }
 0x4d3   : > { %v1846_v21 = vsel %vm1370_vm1, %v1841_v20, 0 }
 0x4d4   : > { %3885 = vmatpush3.bf16.msra.mxu1 %v4000_v10  ;;  %3859 = vmatpush3.bf16.xpose.msra.mxu0 %v1846_v21 }
 0x4d5   : > { %3886 = vmatprep.subr.bf16.mxu1 %v4155_v27  ;;  %3864 = vmatprep.subr.bf16.mxu0 %v4155_v27 }
 0x4d8   : > { %3887 = vmatpush3.bf16.msra.mxu1 %v4001_v12 }
 0x4d9   : > { %3888 = vmatprep.subr.bf16.mxu1 %v4155_v27 }
 0x4dc   : > { %3889 = vmatpush3.bf16.msra.mxu1 %v4002_v13  ;;  %v4003_v13 = vld [vmem:[%s4339_s22 + $0x20] sm:$0xff]  }
 0x562   : > { %v1480_v22 = vpop.f32.mrb[8].mxu1 }
 0x563   : > { %v3796_v23 = vpop.f32.mrb[9].mxu1 }
 0x564   : > { %v1483_v24 = vpop.f32.mrb[10].mxu1  ;;  %v3495_v23 = vld [vmem:[%s4890_s2] ss:$0 sm:$0xff] }
 0x565   : > { %v1487_v25 = vpack.c.bf16 %v1483_v24, %v1480_v22  ;;  %v3797_v26 = vpop.f32.mrb[11].mxu1 }
 0x567   : > { %3891 = vmatmul.mubr.msk.bf16.vlgmr.msra.gmra.mrb[20].mxu1 %vm1370_vm1, %v1487_v25 }
 0x582   : > { %v1603_v29 = vpop.f32.mrb[12].mxu1 }
 0x583   : > { %v1604_v30 = vadd.f32 %v3414_v28, %v1603_v29  ;;  %v3816_v31 = vpop.f32.mrb[13].mxu1 }
 0x584   : > { %v1606_v32 = vpop.f32.mrb[14].mxu1 }
 0x585   : > { %v1607_v33 = vadd.f32 %v3414_v28, %v1606_v32  ;;  %v3817_v34 = vpop.f32.mrb[15].mxu1  ;;  %v1610_v35 = vmul.f32 0.125, %v1604_v30 }
 0x586   : > { %v4009_v34 = vld [vmem:[%s4353_s9 + $0x4] ss:$16 sps:$4 sm:$0xff]  }
 0x587   : > { %v1611_v36 = vmul.f32 0.125, %v1607_v33  ;;  %v4007_v33 = vld [vmem:[%s4353_s9] ss:$16 sps:$4 sm:$0xff]  }
 0x589   : > { %v1840_v37 = vpack.c.bf16 %v1611_v36, %v1610_v35  ;;  %v4010_v35 = vld [vmem:[%s4353_s9 + $0x8] ss:$16 sps:$4 sm:$0xff]   ;;  %v4012_v36 = vld [vmem:[%s4353_s9 + $0xc] ss:$16 sps:$4 sm:$0xff]  }
 0x58a   : > { %2413 = vmatprep.subr.bf16.mxu1 %v4012_v36  ;;  %v4064_v36 = vld [vmem:[%s4364_s20 + $0xd0] sm:$0xff]  }
 0x58b   : > { %3861 = vmatmul.mubr.msk.bf16.vlgmr.msra.gmra.mrb[12].mxu0 %vm1370_vm1, %v1840_v37  ;;  %v4015_v37 = vld [vmem:[%s4353_s9 + $0x24] ss:$16 sps:$4 sm:$0xff]   ;;  %2414 = vmatpush1.bf16.msra.mxu1 %v4010_v35 }
 0x58c   : > { %3866 = vmatprep.mubr.msk.bf16.mxu0 %vm4156_vm0, %v4155_v27  ;;  %v4063_v35 = vld [vmem:[%s4364_s20 + $0x50] sm:$0xff]  }
 0x5a2   : > { %v1833_v39 = vpop.f32.mrb[16].mxu1 }
 0x5a3   : > { %v1834_v40 = vadd.f32 %v3466_v38, %v1833_v39  ;;  %v3856_v41 = vpop.f32.mrb[17].mxu1  ;;  %v4013_v39 = vld [vmem:[%s4353_s9 + $0x20] ss:$16 sps:$4 sm:$0xff]  }
 0x5a4   : > { %v1836_v44 = vpop.f32.mrb[18].mxu1 }
 0x5a5   : > { %v1837_v46 = vadd.f32 %v3466_v38, %v1836_v44  ;;  %v3857_v47 = vpop.f32.mrb[19].mxu1  ;;  %v4018_v38 = vld [vmem:[%s4353_s9 + $0x2c] ss:$16 sps:$4 sm:$0xff]  }
 0x5a6   : > { %2415 = vmatprep.subr.bf16.mxu1 %v4018_v38  ;;  %v4066_v38 = vld [vmem:[%s4364_s20 + $0x90] sm:$0xff]  }
 0x5a7   : > { %v1912_v48 = vpack.c.bf16 %v1837_v46, %v1834_v40 }
 0x5a9   : > { %3865 = vmatpush3.bf16.msra.mxu0 %v1912_v48 }
 0x5aa   : > { %3870 = vmatprep.subr.bf16.mxu0 %v4155_v27 }
 0x63a   : > { %v2096_v49 = vpop.f32.mrb[20].mxu1 }
 0x63b   : > { %v3892_v50 = vpop.f32.mrb[21].mxu1 }
 0x63c   : > { %v2099_v51 = vpop.f32.mrb[22].mxu1  ;;  %v4021_v50 = vld [vmem:[%s4353_s9 + $0x44] ss:$16 sps:$4 sm:$0xff]  }
 0x63d   : > { %v3893_v52 = vpop.f32.mrb[23].mxu1 }
 0x63e   : > { %v4019_v52 = vld [vmem:[%s4353_s9 + $0x40] ss:$16 sps:$4 sm:$0xff]  }
 0x65e   : > { %v1882_v53 = vpop.f32.mrb[12].mxu0 }
 0x65f   : > { %v1883_v54 = vadd.f32 %v1882_v53, %v4472_v9  ;;  %v3862_v55 = vpop.f32.mrb[13].mxu0  ;;  %v4022_v53 = vld [vmem:[%s4353_s9 + $0x48] ss:$16 sps:$4 sm:$0xff]  }
 0x660   : > { %v1885_v56 = vpop.f32.mrb[14].mxu0  ;;  %v4030_v55 = vld [vmem:[%s4353_s9 + $0x6c] ss:$16 sps:$4 sm:$0xff]  }
 0x661   : > { %v1886_v57 = vadd.f32 %v1885_v56, %v4477_v11  ;;  %v3863_v58 = vpop.f32.mrb[15].mxu0  ;;  %v1889_v59 = vsel %vm1418_vm2, %v1883_v54, -inf  ;;  %v4025_v56 = vld [vmem:[%s4353_s9 + $0x60] ss:$16 sps:$4 sm:$0xff]  }
 0x662   : > { %1890 = vmax.xlane.f32.xlu0 %v1889_v59  ;;  %v4033_v58 = vld [vmem:[%s4353_s9 + $0x84] ss:$16 sps:$4 sm:$0xff]   ;;  %v4036_v59 = vld [vmem:[%s4353_s9 + $0x8c] ss:$16 sps:$4 sm:$0xff]  }
 0x663   : > { %v1892_v60 = vsel %vm1418_vm2, %v1886_v57, -inf }
 0x664   : > { %1893 = vmax.xlane.f32.xlu1 %v1892_v60  ;;  %v4031_v60 = vld [vmem:[%s4353_s9 + $0x80] ss:$16 sps:$4 sm:$0xff]  }
 0x6ef   : > { %v1891_v61 = vpop.xlane.xlu0 %1890 }
 0x6f0   : > { %v1895_v62 = vsub.f32 %v1883_v54, %v1891_v61  ;;  %v4027_v54 = vld [vmem:[%s4353_s9 + $0x64] ss:$16 sps:$4 sm:$0xff]   ;;  %v4034_v61 = vld [vmem:[%s4353_s9 + $0x88] ss:$16 sps:$4 sm:$0xff]  }
 0x6f1   : > { %v1894_v63 = vpop.xlane.xlu1 %1893 }
 0x6f2   : > { %v1897_v0 = vmul.f32 1.442695, %v1895_v62  ;;  %v1896_v1 = vsub.f32 %v1886_v57, %v1894_v63  ;;  %v4028_v57 = vld [vmem:[%s4353_s9 + $0x68] ss:$16 sps:$4 sm:$0xff]   ;;  %v4039_v62 = vld [vmem:[%s4353_s9 + $0xa4] ss:$16 sps:$4 sm:$0xff]  }
 0x6f3   : > { %v4042_v63 = vld [vmem:[%s4353_s9 + $0xac] ss:$16 sps:$4 sm:$0xff]  }
 0x6f4   : > { %4095 = vpow2.f32 %v1897_v0  ;;  %v1899_v2 = vmul.f32 1.442695, %v1896_v1  ;;  %v4037_v0 = vld [vmem:[%s4353_s9 + $0xa0] ss:$16 sps:$4 sm:$0xff]   ;;  %v4040_v1 = vld [vmem:[%s4353_s9 + $0xa8] ss:$16 sps:$4 sm:$0xff]  }
 0x6f6   : > { %4097 = vpow2.f32 %v1899_v2  ;;  %v4045_v2 = vld [vmem:[%s4353_s9 + $0xc4] ss:$16 sps:$4 sm:$0xff]  }
 0x6fe   : > { %v4096_v9 = vpop.eup %4095 }
 0x6ff   : > { %v1901_v3 = vsel %vm1418_vm2, %v4096_v9, 0.0 }
 0x700   : > { %v4098_v11 = vpop.eup %4097  ;;  %1902 = vadd.xlane.f32.xlu0 %v1901_v3  ;;  %v4043_v3 = vld [vmem:[%s4353_s9 + $0xc0] ss:$16 sps:$4 sm:$0xff]  }
 0x701   : > { %v1904_v4 = vsel %vm1418_vm2, %v4098_v11, 0.0 }
 0x702   : > { %1905 = vadd.xlane.f32.xlu1 %v1904_v4  ;;  %v4049_v4 = vld [vmem:[%s4353_s9 + $0xe0] ss:$16 sps:$4 sm:$0xff]  }
 0x78d   : > { %v1903_v5 = vpop.xlane.xlu0 %1902 }
 0x78e   : > { %4099 = vrcp.f32 %v1903_v5  ;;  %v4051_v5 = vld [vmem:[%s4353_s9 + $0xe4] ss:$16 sps:$4 sm:$0xff]  }
 0x78f   : > { %v1906_v6 = vpop.xlane.xlu1 %1905 }
 0x790   : > { %4101 = vrcp.f32 %v1906_v6  ;;  %v4052_v6 = vld [vmem:[%s4353_s9 + $0xe8] ss:$16 sps:$4 sm:$0xff]  }
 0x798   : > { %v4100_v7 = vpop.eup %4099 }
 0x799   : > { %v1909_v10 = vmul.f32 %v4100_v7, %v4096_v9  ;;  %v4048_v9 = vld [vmem:[%s4353_s9 + $0xcc] ss:$16 sps:$4 sm:$0xff]  }
 0x79a   : > { %v4102_v8 = vpop.eup %4101  ;;  %v4054_v7 = vld [vmem:[%s4353_s9 + $0xec] ss:$16 sps:$4 sm:$0xff]  }
 0x79b   : > { %v1910_v12 = vmul.f32 %v4102_v8, %v4098_v11  ;;  %v4046_v11 = vld [vmem:[%s4353_s9 + $0xc8] ss:$16 sps:$4 sm:$0xff]   ;;  %v4157_v8 = vmov 0  }
 0x79c   : > { %2445 = vmatprep.mubr.bf16.mxu1 %v4157_v8 }
 0x79d   : > { %v1911_v14 = vpack.c.bf16 %v1910_v12, %v1909_v10 }
 0x79f   : > { %3867 = vmatmul.mubr.msk.bf16.vlgmr.msra.gmra.mrb[16].mxu0 %vm1418_vm2, %v1911_v14 }
 0x7a0   : > { %3871 = vmatpush3.bf16.msra.mxu0 %v4003_v13  ;;  %3878 = vmatprep.mubr.msk.bf16.mxu0 %vm4156_vm0, %v4155_v27 }
 0x7a1   : > { %3872 = vmatprep.subr.bf16.mxu0 %v4155_v27 }
 0x7a4   : > { %3873 = vmatpush3.bf16.msra.mxu0 %v4004_v15 }
 0x7a5   : > { %3874 = vmatprep.subr.bf16.mxu0 %v4155_v27 }
 0x7a8   : > { %3875 = vmatpush3.bf16.msra.mxu0 %v4005_v45 }
 0x7a9   : > { %3876 = vmatprep.subr.bf16.mxu0 %v4155_v27 }
 0x7ac   : > { %3877 = vmatpush3.bf16.msra.mxu0 %v4006_v16 }
 0x7ad   : > { %2370 = vmatprep.subr.bf16.mxu0 %v4009_v34  ;;  %v4062_v34 = vld [vmem:[%s4364_s20 + $0x88] sm:$0xff]  }
 0x872   : > { %v1950_v17 = vpop.f32.mrb[16].mxu0 }
 0x873   : > { %v3868_v18 = vpop.f32.mrb[17].mxu0 }
 0x874   : > { %v1953_v19 = vpop.f32.mrb[18].mxu0 }
 0x875   : > { %v1957_v20 = vpack.c.bf16 %v1953_v19, %v1950_v17  ;;  %v3869_v21 = vpop.f32.mrb[19].mxu0  ;;  %v3496_v17 = vld [vmem:[%s4891_s3] ss:$0 sm:$0xff] }
 0x877   : > { %3879 = vmatmul.mubr.msk.bf16.vlgmr.msra.gmra.mrb[20].mxu0 %vm1370_vm1, %v1957_v20 }
 0x878   : > { %2371 = vmatpush1.bf16.msra.mxu0 %v4007_v33  ;;  %2402 = vmatprep.mubr.bf16.mxu0 %v4157_v8  ;;  %v4061_v33 = vld [vmem:[%s4364_s20 + $0x8] sm:$0xff]  }
 0x879   : > { %2372 = vmatprep.subr.bf16.mxu0 %v4015_v37  ;;  %v4065_v37 = vld [vmem:[%s4364_s20 + $0x10] sm:$0xff]  }
 0x87c   : > { %2373 = vmatpush1.bf16.msra.mxu0 %v4013_v39  ;;  %v4067_v39 = vld [vmem:[%s4364_s20 + $0x58] sm:$0xff]  }
 0x87d   : > { %2374 = vmatprep.subr.bf16.mxu0 %v4021_v50  ;;  %v4077_v50 = vld [vmem:[%s4364_s20 + $0x28] sm:$0xff]  }
 0x880   : > { %2375 = vmatpush1.bf16.msra.mxu0 %v4019_v52  ;;  %v4079_v52 = vld [vmem:[%s4364_s20 + $0x70] sm:$0xff]  }
 0x881   : > { %2376 = vmatprep.subr.bf16.mxu0 %v4027_v54  ;;  %v4081_v54 = vld [vmem:[%s4364_s20 + $0x30] sm:$0xff]  }
 0x884   : > { %2377 = vmatpush1.bf16.msra.mxu0 %v4025_v56  ;;  %v4083_v56 = vld [vmem:[%s4364_s20 + $0x78] sm:$0xff]  }
 0x885   : > { %2378 = vmatprep.subr.bf16.mxu0 %v4033_v58  ;;  %v4085_v58 = vld [vmem:[%s4364_s20 + $0x38] sm:$0xff]  }
 0x888   : > { %2379 = vmatpush1.bf16.msra.mxu0 %v4031_v60  ;;  %v2190_v60 = vlaneseq }
 0x889   : > { %2380 = vmatprep.subr.bf16.mxu0 %v4039_v62 }
 0x88c   : > { %2381 = vmatpush1.bf16.msra.mxu0 %v4037_v0  ;;  %v2188_v0 = vld [vmem:[%s4359_s24] sm:$0xf] }
 0x88d   : > { %2382 = vmatprep.subr.bf16.mxu0 %v4045_v2 }
 0x890   : > { %2383 = vmatpush1.bf16.msra.mxu0 %v4043_v3 }
 0x891   : > { %2384 = vmatprep.subr.bf16.mxu0 %v4051_v5 }
 0x894   : > { %2385 = vmatpush1.bf16.msra.mxu0 %v4049_v4 }
 0x94a   : > { %v2028_v22 = vpop.f32.mrb[20].mxu0 }
 0x94b   : > { %v2097_v27 = vadd.f32 %v2096_v49, %v2028_v22  ;;  %v3880_v24 = vpop.f32.mrb[21].mxu0  ;;  %v3497_v22 = vld [vmem:[%s4892_s5] ss:$0 sm:$0xff] }
 0x94c   : > { %v2031_v25 = vpop.f32.mrb[22].mxu0 }
 0x94d   : > { %v2110_v26 = vadd.f32 %v3495_v23, %v2097_v27  ;;  %v2100_v28 = vadd.f32 %v2099_v51, %v2031_v25  ;;  %v3881_v29 = vpop.f32.mrb[23].mxu0  ;;  %v4024_v51 = vld [vmem:[%s4353_s9 + $0x4c] ss:$16 sps:$4 sm:$0xff]  }
 0x94e   : > { %v4057_v29 = vld [vmem:[%s4364_s20] sm:$0xff]  }
 0x94f   : > { %v2111_v30 = vadd.f32 %v3495_v23, %v2100_v28  ;;  %v2112_v31 = vadd.f32 %v2110_v26, %v4424_v42  ;;  %v4016_v42 = vld [vmem:[%s4353_s9 + $0x28] ss:$16 sps:$4 sm:$0xff]   ;;  %v4055_v26 = vld [vmem:[%s4364_s20 + $0x40] sm:$0xff]   ;;  %s4894_s9 = sld [smem:[#allocation22_spill]] (!%p3565_p5) }
 0x950   : > { %2416 = vmatpush1.bf16.msra.mxu1 %v4016_v42  ;;  %v4056_v28 = vld [vmem:[%s4364_s20 + $0xc0] sm:$0xff]   ;;  %3664 = vmatprep.subr.bf16.mxu0 %v4055_v26  ;;  %v4068_v42 = vld [vmem:[%s4364_s20 + $0xd8] sm:$0xff]  }
 0x951   : > { %2116 = vadd.xlane.f32.xlu0 %v2112_v31  ;;  %v2113_v32 = vadd.f32 %v2111_v30, %v4426_v43  ;;  %2417 = vmatprep.subr.bf16.mxu1 %v4024_v51  ;;  %v4058_v30 = vld [vmem:[%s4364_s20 + $0x80] sm:$0xff]   ;;  %v4078_v51 = vld [vmem:[%s4364_s20 + $0xa8] sm:$0xff]  }
 0x953   : > { %2118 = vadd.xlane.f32.xlu1 %v2113_v32 }
 0x954   : > { %2418 = vmatpush1.bf16.msra.mxu1 %v4022_v53  ;;  %v4080_v53 = vld [vmem:[%s4364_s20 + $0xf0] sm:$0xff]  }
 0x955   : > { %2419 = vmatprep.subr.bf16.mxu1 %v4030_v55  ;;  %v4082_v55 = vld [vmem:[%s4364_s20 + $0xb0] sm:$0xff]  }
 0x958   : > { %2420 = vmatpush1.bf16.msra.mxu1 %v4028_v57  ;;  %v4084_v57 = vld [vmem:[%s4364_s20 + $0xf8] sm:$0xff]  }
 0x959   : > { %2421 = vmatprep.subr.bf16.mxu1 %v4036_v59  ;;  %v4086_v59 = vld [vmem:[%s4364_s20 + $0xb8] sm:$0xff]  }
 0x95c   : > { %2422 = vmatpush1.bf16.msra.mxu1 %v4034_v61  ;;  %v2191_v61 = vshrl.u32 %v2190_v60, 7 }
 0x95d   : > { %2423 = vmatprep.subr.bf16.mxu1 %v4042_v63 }
 0x95e   : > { %v2192_v62 = vsub.s32 0, %v2191_v61  ;;  %v2200_v63 = vsub.s32 2, %v2191_v61  ;;  %v2204_v2 = vsub.s32 3, %v2191_v61 }
 0x960   : > { %2424 = vmatpush1.bf16.msra.mxu1 %v4040_v1  ;;  %v2196_v1 = vsub.s32 1, %v2191_v61  ;;  %v2201_v3 = vrot.slane %v2188_v0, %v2200_v63  ;;  %v2205_v4 = vrot.slane %v2188_v0, %v2204_v2 }
 0x961   : > { %2425 = vmatprep.subr.bf16.mxu1 %v4048_v9  ;;  %v2193_v9 = vrot.slane %v2188_v0, %v2192_v62 }
 0x964   : > { %2426 = vmatpush1.bf16.msra.mxu1 %v4046_v11  ;;  %v2197_v11 = vrot.slane %v2188_v0, %v2196_v1 }
 0x965   : > { %2427 = vmatprep.subr.bf16.mxu1 %v4054_v7 }
 0x968   : > { %2428 = vmatpush1.bf16.msra.mxu1 %v4052_v6 }
 0x969   : > { %3686 = vmatprep.subr.bf16.mxu1 %v4056_v28 }
 0x9de   : > { %v2117_v43 = vpop.xlane.xlu0 %2116 }
 0x9df   : > { %v2121_v40 = vmul.f32 0.0078125, %v2117_v43  ;;  %v4069_v43 = vld [vmem:[%s4364_s20 + $0x18] sm:$0xff]  }
 0x9e0   : > { %v2119_v41 = vpop.xlane.xlu1 %2118 }
 0x9e1   : > { %v4596_v44 = vsub.f32 %v2112_v31, %v2121_v40  ;;  %v2122_v46 = vmul.f32 0.0078125, %v2119_v41  ;;  %v4059_v31 = vld [vmem:[%s4364_s20 + $0x48] sm:$0xff]   ;;  %v4070_v40 = vld [vmem:[%s4364_s20 + $0x98] sm:$0xff]   ;;  %v4071_v41 = vld [vmem:[%s4364_s20 + $0x60] sm:$0xff]  }
 0x9e3   : > { %v4598_v47 = vsub.f32 %v2113_v32, %v2122_v46  ;;  %v2125_v48 = vmul.f32 %v4596_v44, %v4596_v44  ;;  %v4060_v32 = vld [vmem:[%s4364_s20 + $0xc8] sm:$0xff]   ;;  %v4073_v46 = vld [vmem:[%s4364_s20 + $0x20] sm:$0xff]  }
 0x9e5   : > { %2127 = vadd.xlane.f32.xlu0 %v2125_v48  ;;  %v2126_v49 = vmul.f32 %v4598_v47, %v4598_v47  ;;  %v4075_v48 = vld [vmem:[%s4364_s20 + $0x68] sm:$0xff]  }
 0x9e7   : > { %2129 = vadd.xlane.f32.xlu1 %v2126_v49  ;;  %v4076_v49 = vld [vmem:[%s4364_s20 + $0xe8] sm:$0xff]  }
 0xa72   : > { %v2128_v10 = vpop.xlane.xlu0 %2127 }
 0xa73   : > { %v2131_v12 = vmul.f32 0.0078125, %v2128_v10 }
 0xa74   : > { %v2130_v13 = vpop.xlane.xlu1 %2129 }
 0xa75   : > { %v2133_v14 = vadd.f32 1e-12, %v2131_v12  ;;  %v2132_v15 = vmul.f32 0.0078125, %v2130_v13 }
 0xa77   : > { %4103 = vrsqrt.f32 %v2133_v14  ;;  %v2134_v45 = vadd.f32 1e-12, %v2132_v15 }
 0xa79   : > { %4105 = vrsqrt.f32 %v2134_v45 }
 0xa81   : > { %v4104_v16 = vpop.eup %4103 }
 0xa82   : > { %v2137_v18 = vmul.f32 %v4104_v16, %v4596_v44  ;;  %v4072_v44 = vld [vmem:[%s4364_s20 + $0xe0] sm:$0xff]  }
 0xa83   : > { %v4106_v19 = vpop.eup %4105 }
 0xa84   : > { %v2138_v20 = vmul.f32 %v4106_v19, %v4598_v47  ;;  %v2145_v21 = vmul.f32 %v3496_v17, %v2137_v18  ;;  %v4074_v47 = vld [vmem:[%s4364_s20 + $0xa0] sm:$0xff]  }
 0xa86   : > { %v2146_v23 = vmul.f32 %v3496_v17, %v2138_v20  ;;  %v4640_v27 = vadd.f32 %v3497_v22, %v2145_v21 }
 0xa88   : > { %v4642_v24 = vadd.f32 %v3497_v22, %v2146_v23 }
 0xa8a   : > { %v2155_v25 = vpack.c.bf16 %v4642_v24, %v4640_v27 }
 0xa8c   : > { %2403 = vmatmul.mubr.bf16.vlgmr.msra.gmra.mrb[24].mxu0 %v2155_v25  ;;  %2446 = vmatmul.mubr.bf16.vlgmr.msra.gmra.mrb[24].mxu1 %v2155_v25 }
 0xa8d   : > { %3665 = vmatpush3.bf16.msra.mxu0 %v4057_v29  ;;  %3687 = vmatpush3.bf16.msra.mxu1 %v4058_v30 }
 0xa8e   : > { %3666 = vmatprep.subr.bf16.mxu0 %v4059_v31  ;;  %3688 = vmatprep.subr.bf16.mxu1 %v4060_v32 }
 0xa91   : > { %3667 = vmatpush3.bf16.msra.mxu0 %v4061_v33  ;;  %3689 = vmatpush3.bf16.msra.mxu1 %v4062_v34 }
 0xa92   : > { %3668 = vmatprep.subr.bf16.mxu0 %v4063_v35  ;;  %3690 = vmatprep.subr.bf16.mxu1 %v4064_v36 }
 0xa95   : > { %3669 = vmatpush3.bf16.msra.mxu0 %v4065_v37  ;;  %3691 = vmatpush3.bf16.msra.mxu1 %v4066_v38 }
 0xa96   : > { %3670 = vmatprep.subr.bf16.mxu0 %v4067_v39  ;;  %3692 = vmatprep.subr.bf16.mxu1 %v4068_v42 }
 0xa99   : > { %3671 = vmatpush3.bf16.msra.mxu0 %v4069_v43  ;;  %3693 = vmatpush3.bf16.msra.mxu1 %v4070_v40 }
 0xa9a   : > { %3672 = vmatprep.subr.bf16.mxu0 %v4071_v41  ;;  %3694 = vmatprep.subr.bf16.mxu1 %v4072_v44 }
 0xa9d   : > { %3673 = vmatpush3.bf16.msra.mxu0 %v4073_v46  ;;  %3695 = vmatpush3.bf16.msra.mxu1 %v4074_v47 }
 0xa9e   : > { %3674 = vmatprep.subr.bf16.mxu0 %v4075_v48  ;;  %3696 = vmatprep.subr.bf16.mxu1 %v4076_v49 }
 0xaa1   : > { %3675 = vmatpush3.bf16.msra.mxu0 %v4077_v50  ;;  %3697 = vmatpush3.bf16.msra.mxu1 %v4078_v51 }
 0xaa2   : > { %3676 = vmatprep.subr.bf16.mxu0 %v4079_v52  ;;  %3698 = vmatprep.subr.bf16.mxu1 %v4080_v53 }
 0xaa5   : > { %3677 = vmatpush3.bf16.msra.mxu0 %v4081_v54  ;;  %3699 = vmatpush3.bf16.msra.mxu1 %v4082_v55 }
 0xaa6   : > { %3678 = vmatprep.subr.bf16.mxu0 %v4083_v56  ;;  %3700 = vmatprep.subr.bf16.mxu1 %v4084_v57 }
 0xaa9   : > { %3679 = vmatpush3.bf16.msra.mxu0 %v4085_v58  ;;  %3701 = vmatpush3.bf16.msra.mxu1 %v4086_v59 }
 0xb5f   : > { %v2404_v5 = vpop.f32.mrb[24].mxu0  ;;  %v2447_v6 = vpop.f32.mrb[24].mxu1 }
 0xb60   : > { %v4679_v7 = vadd.f32 %v2404_v5, %v2193_v9  ;;  %v4681_v8 = vadd.f32 %v2447_v6, %v2201_v3  ;;  %v2406_v10 = vpop.f32.mrb[25].mxu0  ;;  %v2449_v12 = vpop.f32.mrb[25].mxu1 }
 0xb61   : > { %v4683_v13 = vadd.f32 %v2406_v10, %v2197_v11  ;;  %v4685_v14 = vadd.f32 %v2449_v12, %v2205_v4  ;;  %v2408_v15 = vpop.f32.mrb[26].mxu0  ;;  %v2451_v45 = vpop.f32.mrb[26].mxu1 }
 0xb62   : > { %v2456_v16 = vmul.f32 %v4679_v7, %v4679_v7  ;;  %v2458_v17 = vmul.f32 %v4681_v8, %v4681_v8  ;;  %v4691_v18 = vadd.f32 %v2408_v15, %v2193_v9  ;;  %v4693_v19 = vadd.f32 %v2451_v45, %v2201_v3  ;;  %v2410_v20 = vpop.f32.mrb[27].mxu0  ;;  %v2453_v21 = vpop.f32.mrb[27].mxu1 }
 0xb63   : > { %v2457_v22 = vmul.f32 %v4683_v13, %v4683_v13  ;;  %v2459_v23 = vmul.f32 %v4685_v14, %v4685_v14  ;;  %v4699_v25 = vadd.f32 %v2410_v20, %v2197_v11  ;;  %v4701_v26 = vadd.f32 %v2453_v21, %v2205_v4 }
 0xb64   : > { %v2464_v28 = vmul.f32 %v2456_v16, %v4679_v7  ;;  %v2466_v29 = vmul.f32 %v2458_v17, %v4681_v8  ;;  %v2460_v30 = vmul.f32 %v4691_v18, %v4691_v18  ;;  %v2462_v31 = vmul.f32 %v4693_v19, %v4693_v19 }
 0xb65   : > { %v2465_v32 = vmul.f32 %v2457_v22, %v4683_v13  ;;  %v2467_v33 = vmul.f32 %v2459_v23, %v4685_v14  ;;  %v2461_v34 = vmul.f32 %v4699_v25, %v4699_v25  ;;  %v2463_v35 = vmul.f32 %v4701_v26, %v4701_v26 }
 0xb66   : > { %v2472_v36 = vmul.f32 0.044715, %v2464_v28  ;;  %v2474_v37 = vmul.f32 0.044715, %v2466_v29  ;;  %v2468_v38 = vmul.f32 %v2460_v30, %v4691_v18  ;;  %v2470_v39 = vmul.f32 %v2462_v31, %v4693_v19 }
 0xb67   : > { %v2473_v42 = vmul.f32 0.044715, %v2465_v32  ;;  %v2475_v43 = vmul.f32 0.044715, %v2467_v33  ;;  %v2469_v40 = vmul.f32 %v2461_v34, %v4699_v25  ;;  %v2471_v41 = vmul.f32 %v2463_v35, %v4701_v26 }
 0xb68   : > { %v2480_v44 = vadd.f32 %v2472_v36, %v4679_v7  ;;  %v2482_v46 = vadd.f32 %v2474_v37, %v4681_v8  ;;  %v2476_v47 = vmul.f32 0.044715, %v2468_v38  ;;  %v2478_v48 = vmul.f32 0.044715, %v2470_v39 }
 0xb69   : > { %v2481_v49 = vadd.f32 %v2473_v42, %v4683_v13  ;;  %v2483_v50 = vadd.f32 %v2475_v43, %v4685_v14  ;;  %v2477_v51 = vmul.f32 0.044715, %v2469_v40  ;;  %v2479_v52 = vmul.f32 0.044715, %v2471_v41 }
 0xb6a   : > { %v2488_v53 = vmul.f32 0.7978846, %v2480_v44  ;;  %v2490_v54 = vmul.f32 0.7978846, %v2482_v46  ;;  %v2484_v55 = vadd.f32 %v2476_v47, %v4691_v18  ;;  %v2486_v56 = vadd.f32 %v2478_v48, %v4693_v19 }
 0xb6b   : > { %v2489_v57 = vmul.f32 0.7978846, %v2481_v49  ;;  %v2491_v58 = vmul.f32 0.7978846, %v2483_v50  ;;  %v2485_v59 = vadd.f32 %v2477_v51, %v4699_v25  ;;  %v2487_v60 = vadd.f32 %v2479_v52, %v4701_v26 }
 0xb6c   : > { %4107 = vtanh.f32 %v2488_v53  ;;  %v2492_v61 = vmul.f32 0.7978846, %v2484_v55  ;;  %v2494_v62 = vmul.f32 0.7978846, %v2486_v56 }
 0xb6d   : > { %4109 = vtanh.f32 %v2490_v54  ;;  %v2493_v63 = vmul.f32 0.7978846, %v2485_v59  ;;  %v2495_v0 = vmul.f32 0.7978846, %v2487_v60 }
 0xb6e   : > { %4111 = vtanh.f32 %v2489_v57 }
 0xb6f   : > { %4113 = vtanh.f32 %v2491_v58 }
 0xb70   : > { %4115 = vtanh.f32 %v2492_v61 }
 0xb71   : > { %4117 = vtanh.f32 %v2494_v62 }
 0xb72   : > { %4119 = vtanh.f32 %v2493_v63 }
 0xb73   : > { %4121 = vtanh.f32 %v2495_v0 }
 0xb76   : > { %v4108_v1 = vpop.eup %4107 }
 0xb77   : > { %v4110_v2 = vpop.eup %4109  ;;  %v2504_v9 = vadd.f32 1.0, %v4108_v1 }
 0xb78   : > { %v4112_v3 = vpop.eup %4111  ;;  %v2506_v11 = vadd.f32 1.0, %v4110_v2 }
 0xb79   : > { %v4114_v4 = vpop.eup %4113  ;;  %v2505_v5 = vadd.f32 1.0, %v4112_v3  ;;  %v2512_v15 = vmul.f32 0.5, %v2504_v9 }
 0xb7a   : > { %v4116_v6 = vpop.eup %4115  ;;  %v2507_v10 = vadd.f32 1.0, %v4114_v4  ;;  %v2514_v17 = vmul.f32 0.5, %v2506_v11 }
 0xb7b   : > { %v4118_v12 = vpop.eup %4117  ;;  %v2508_v45 = vadd.f32 1.0, %v4116_v6  ;;  %v2513_v28 = vmul.f32 0.5, %v2505_v5  ;;  %v2520_v32 = vmul.f32 %v2512_v15, %v4679_v7  ;;  %v3563_v5 = vld [vmem:[%s971_s30] ss:$0 sm:$0xff]  ;;  %s4893_s30 = sld [smem:[#allocation20_spill]] (!%p3565_p5) }
 0xb7c   : > { %v4120_v16 = vpop.eup %4119  ;;  %v2510_v20 = vadd.f32 1.0, %v4118_v12  ;;  %v2515_v31 = vmul.f32 0.5, %v2507_v10  ;;  %v2522_v35 = vmul.f32 %v2514_v17, %v4681_v8  ;;  %v3564_v12 = vld [vmem:[%s974_s14] ss:$0 sm:$0xff] }
 0xb7d   : > { %v4122_v21 = vpop.eup %4121  ;;  %v2516_v22 = vmul.f32 0.5, %v2508_v45  ;;  %v2509_v23 = vadd.f32 1.0, %v4120_v16  ;;  %v2521_v38 = vmul.f32 %v2513_v28, %v4683_v13  ;;  %v3530_v13 = vld [vmem:[%s968_s29] ss:$0 sm:$0xff]  ;;  %s4895_s29 = sld [smem:[#allocation21_spill]] (!%p3565_p5) }
 0xb7e   : > { %v2518_v29 = vmul.f32 0.5, %v2510_v20  ;;  %v2511_v30 = vadd.f32 1.0, %v4122_v21  ;;  %v2523_v43 = vmul.f32 %v2515_v31, %v4685_v14  ;;  %v4136_v31 = vld [vmem:[%s4894_s9 + $0x8] sm:$0xff] (!%p3565_p5)  }
 0xb7f   : > { %v2524_v33 = vmul.f32 %v2516_v22, %v4691_v18  ;;  %v2517_v34 = vmul.f32 0.5, %v2509_v23  ;;  %v4158_v22 = vmov (!%p3565_p5), 0.0  }
 0xb80   : > { %v2526_v36 = vmul.f32 %v2518_v29, %v4693_v19  ;;  %v2519_v37 = vmul.f32 0.5, %v2511_v30  ;;  %3894 = vmatprep.subr.bf16.mxu0 (!%p3565_p5), %v4158_v22  ;;  %3914 = vmatprep.subr.bf16.mxu1 (!%p3565_p5), %v4158_v22  ;;  %v4135_v29 = vld [vmem:[%s4894_s9] sm:$0xff] (!%p3565_p5)  }
 0xb81   : > { %v2525_v39 = vmul.f32 %v2517_v34, %v4699_v25  ;;  %v2528_v42 = vpack.c.bf16 %v2524_v33, %v2520_v32  ;;  %v4127_v21 = vld [vmem:[%s4893_s30] sm:$0xff] (!%p3565_p5)   ;;  %v4128_v23 = vld [vmem:[%s4893_s30 + $0x8] sm:$0xff] (!%p3565_p5)   ;;  %v4129_v28 = vld [vmem:[%s4893_s30 + $0x10] sm:$0xff] (!%p3565_p5)  }
 0xb82   : > { %v2527_v40 = vmul.f32 %v2519_v37, %v4701_v26  ;;  %v2530_v41 = vpack.c.bf16 %v2526_v36, %v2522_v35  ;;  %v4130_v30 = vld [vmem:[%s4893_s30 + $0x18] sm:$0xff] (!%p3565_p5)   ;;  %v4131_v32 = vld [vmem:[%s4893_s30 + $0x20] sm:$0xff] (!%p3565_p5)   ;;  %v4137_v33 = vld [vmem:[%s4894_s9 + $0x10] sm:$0xff] (!%p3565_p5)  }
 0xb83   : > { %v2529_v7 = vpack.c.bf16 %v2525_v39, %v2521_v38  ;;  %v4132_v34 = vld [vmem:[%s4893_s30 + $0x28] sm:$0xff] (!%p3565_p5)   ;;  %v4138_v35 = vld [vmem:[%s4894_s9 + $0x18] sm:$0xff] (!%p3565_p5)   ;;  %v4133_v36 = vld [vmem:[%s4893_s30 + $0x30] sm:$0xff] (!%p3565_p5)  }
 0xb84   : > { %v2531_v44 = vpack.c.bf16 %v2527_v40, %v2523_v43  ;;  %v4134_v37 = vld [vmem:[%s4893_s30 + $0x38] sm:$0xff] (!%p3565_p5)   ;;  %v4139_v39 = vld [vmem:[%s4894_s9 + $0x20] sm:$0xff] (!%p3565_p5)   ;;  %v4141_v43 = vld [vmem:[%s4894_s9 + $0x30] sm:$0xff] (!%p3565_p5)  }
 0xb85   : > { %2827 = vmatprep.mubr.bf16.mxu0 %v2529_v7  ;;  %v4142_v40 = vld [vmem:[%s4894_s9 + $0x38] sm:$0xff] (!%p3565_p5)  }
 0xb86   : > { %2868 = vmatprep.mubr.bf16.mxu1 %v2531_v44  ;;  %2828 = vmatmul.mubr.bf16.vlgmr.msra.gmra.mrb[28].mxu0 %v2528_v42  ;;  %v4140_v42 = vld [vmem:[%s4894_s9 + $0x28] sm:$0xff] (!%p3565_p5)  }
 0xb87   : > { %2869 = vmatmul.mubr.bf16.vlgmr.msra.gmra.mrb[28].mxu1 %v2530_v41  ;;  %3895 = vmatpush3.bf16.msra.mxu0 (!%p3565_p5), %v4127_v21  ;;  %v3566_v41 = vld [vmem:[%s4895_s29] ss:$0 sm:$0xff] (!%p3565_p5) }
 0xb88   : > { %3910 = vmatprep.mubr.msk.bf16.mxu0 (!%p3565_p5), %vm4159_vm3, %v4158_v22  ;;  %3896 = vmatprep.subr.bf16.mxu0 (!%p3565_p5), %v4158_v22 }
 0xb89   : > { %3930 = vmatprep.mubr.msk.bf16.mxu1 (!%p3565_p5), %vm4159_vm3, %v4158_v22  ;;  %3915 = vmatpush3.bf16.msra.mxu1 (!%p3565_p5), %v4135_v29 }
 0xb8a   : > { %3916 = vmatprep.subr.bf16.mxu1 (!%p3565_p5), %v4158_v22 }
 0xb8b   : > { %3897 = vmatpush3.bf16.msra.mxu0 (!%p3565_p5), %v4128_v23 }
 0xb8c   : > { %3898 = vmatprep.subr.bf16.mxu0 (!%p3565_p5), %v4158_v22 }
 0xb8d   : > { %3917 = vmatpush3.bf16.msra.mxu1 (!%p3565_p5), %v4136_v31 }
 0xb8e   : > { %3918 = vmatprep.subr.bf16.mxu1 (!%p3565_p5), %v4158_v22 }
 0xb8f   : > { %3899 = vmatpush3.bf16.msra.mxu0 (!%p3565_p5), %v4129_v28 }
 0xb90   : > { %3900 = vmatprep.subr.bf16.mxu0 (!%p3565_p5), %v4158_v22 }
 0xb91   : > { %3919 = vmatpush3.bf16.msra.mxu1 (!%p3565_p5), %v4137_v33 }
 0xb92   : > { %3920 = vmatprep.subr.bf16.mxu1 (!%p3565_p5), %v4158_v22 }
 0xb93   : > { %3901 = vmatpush3.bf16.msra.mxu0 (!%p3565_p5), %v4130_v30 }
 0xb94   : > { %3902 = vmatprep.subr.bf16.mxu0 (!%p3565_p5), %v4158_v22 }
 0xb95   : > { %3921 = vmatpush3.bf16.msra.mxu1 (!%p3565_p5), %v4138_v35 }
 0xb96   : > { %3922 = vmatprep.subr.bf16.mxu1 (!%p3565_p5), %v4158_v22 }
 0xb97   : > { %3903 = vmatpush3.bf16.msra.mxu0 (!%p3565_p5), %v4131_v32 }
 0xb98   : > { %3904 = vmatprep.subr.bf16.mxu0 (!%p3565_p5), %v4158_v22 }
 0xb99   : > { %3923 = vmatpush3.bf16.msra.mxu1 (!%p3565_p5), %v4139_v39 }
 0xb9a   : > { %3924 = vmatprep.subr.bf16.mxu1 (!%p3565_p5), %v4158_v22 }
 0xb9b   : > { %3905 = vmatpush3.bf16.msra.mxu0 (!%p3565_p5), %v4132_v34 }
 0xb9c   : > { %3906 = vmatprep.subr.bf16.mxu0 (!%p3565_p5), %v4158_v22 }
 0xb9d   : > { %3925 = vmatpush3.bf16.msra.mxu1 (!%p3565_p5), %v4140_v42 }
 0xb9e   : > { %3926 = vmatprep.subr.bf16.mxu1 (!%p3565_p5), %v4158_v22 }
 0xb9f   : > { %3907 = vmatpush3.bf16.msra.mxu0 (!%p3565_p5), %v4133_v36 }
 0xba0   : > { %3908 = vmatprep.subr.bf16.mxu0 (!%p3565_p5), %v4158_v22 }
 0xba1   : > { %3927 = vmatpush3.bf16.msra.mxu1 (!%p3565_p5), %v4141_v43 }
 0xba2   : > { %3928 = vmatprep.subr.bf16.mxu1 (!%p3565_p5), %v4158_v22 }
 0xba3   : > { %3909 = vmatpush3.bf16.msra.mxu0 (!%p3565_p5), %v4134_v37 }
 0xba5   : > { %3929 = vmatpush3.bf16.msra.mxu1 (!%p3565_p5), %v4142_v40 }
 0xc59   : > { %v3680_v8 = vpop.f32.mrb[28].mxu0 }
 0xc5a   : > { %v3702_v18 = vpop.f32.mrb[28].mxu1  ;;  %v3681_v19 = vpop.f32.mrb[29].mxu0 }
 0xc5b   : > { %v3682_v25 = vadd.f32 %v3681_v19, %v3680_v8  ;;  %v3703_v46 = vpop.f32.mrb[29].mxu1  ;;  %v3683_v14 = vpop.f32.mrb[30].mxu0 }
 0xc5c   : > { %v3704_v47 = vadd.f32 %v3703_v46, %v3702_v18  ;;  %v3705_v26 = vpop.f32.mrb[30].mxu1  ;;  %v3684_v48 = vpop.f32.mrb[31].mxu0 }
 0xc5d   : > { %v2830_v49 = vadd.f32 %v3682_v25, %v3530_v13  ;;  %v3685_v50 = vadd.f32 %v3684_v48, %v3683_v14  ;;  %v3706_v51 = vpop.f32.mrb[31].mxu1 }
 0xc5e   : > { %v3707_v52 = vadd.f32 %v3706_v51, %v3705_v26 }
 0xc5f   : > { %v2871_v53 = vadd.f32 %v3704_v47, %v2830_v49  ;;  %v2833_v54 = vadd.f32 %v3685_v50, %v3530_v13  ;;  %v3575_v47 = vld [vmem:[%s4896_s10] ss:$0 sm:$0xff] (!%p3565_p5) }
 0xc61   : > { %v2874_v55 = vadd.f32 %v3707_v52, %v2833_v54  ;;  %v2877_v56 = vadd.f32 %v2871_v53, %v4640_v27 }
 0xc63   : > { %2881 = vadd.xlane.f32.xlu0 %v2877_v56  ;;  %v2878_v57 = vadd.f32 %v2874_v55, %v4642_v24 }
 0xc65   : > { %2883 = vadd.xlane.f32.xlu1 %v2878_v57 }
 0xcf0   : > { %v2882_v58 = vpop.xlane.xlu0 %2881 }
 0xcf1   : > { %v2885_v59 = vmul.f32 0.0078125, %v2882_v58 }
 0xcf2   : > { %v2884_v60 = vpop.xlane.xlu1 %2883 }
 0xcf3   : > { %v2887_v61 = vsub.f32 %v2877_v56, %v2885_v59  ;;  %v2886_v62 = vmul.f32 0.0078125, %v2884_v60 }
 0xcf5   : > { %v2888_v63 = vsub.f32 %v2878_v57, %v2886_v62  ;;  %v2889_v0 = vmul.f32 %v2887_v61, %v2887_v61 }
 0xcf7   : > { %2891 = vadd.xlane.f32.xlu0 %v2889_v0  ;;  %v2890_v1 = vmul.f32 %v2888_v63, %v2888_v63 }
 0xcf9   : > { %2893 = vadd.xlane.f32.xlu1 %v2890_v1 }
 0xd84   : > { %v2892_v2 = vpop.xlane.xlu0 %2891 }
 0xd85   : > { %v2895_v9 = vmul.f32 0.0078125, %v2892_v2 }
 0xd86   : > { %v2894_v3 = vpop.xlane.xlu1 %2893 }
 0xd87   : > { %v2897_v27 = vadd.f32 1e-12, %v2895_v9  ;;  %v2896_v11 = vmul.f32 0.0078125, %v2894_v3 }
 0xd89   : > { %4123 = vrsqrt.f32 %v2897_v27  ;;  %v2898_v24 = vadd.f32 1e-12, %v2896_v11 }
 0xd8b   : > { %4125 = vrsqrt.f32 %v2898_v24 }
 0xd93   : > { %v4124_v4 = vpop.eup %4123 }
 0xd94   : > { %v2901_v6 = vmul.f32 %v4124_v4, %v2887_v61 }
 0xd95   : > { %v4126_v10 = vpop.eup %4125 }
 0xd96   : > { %v2909_v15 = vmul.f32 %v3563_v5, %v2901_v6  ;;  %v2902_v45 = vmul.f32 %v4126_v10, %v2888_v63  ;;  %2924 = sbr.rel (%p3565_p5) target bundleno = 3932 (0xf5c), region = 124 }
 0xd98   : > { %v2917_v16 = vadd.f32 %v3564_v12, %v2909_v15  ;;  %v2910_v17 = vmul.f32 %v3563_v5, %v2902_v45 }
 0xd9a   : > { %2919 = vst [vmem:[#allocation2] sm:$0xff] %v2917_v16  ;;  %v2918_v20 = vadd.f32 %v3564_v12, %v2910_v17 }
 0xd9c   : > { %2920 = vst [vmem:[#allocation2 + $0x8] sm:$0xff] %v2918_v20  ;;  %v2925_v38 = vpack.c.bf16 (!%p3565_p5), %v2918_v20, %v2917_v16 }
 0xd9e   : > { %3911 = vmatmul.mubr.bf16.vlgmr.msra.gmra.mrb[0].mxu0 %v2925_v38 }
 0xe71   : > { %v3031_v7 = vpop.f32.mrb[0].mxu0 }
 0xe72   : > { %v3032_v44 = vadd.f32 %v3566_v41, %v3031_v7  ;;  %v3912_v8 = vpop.f32.mrb[1].mxu0 }
 0xe73   : > { %v3034_v18 = vpop.f32.mrb[2].mxu0 }
 0xe74   : > { %v3035_v13 = vadd.f32 %v3566_v41, %v3034_v18  ;;  %v3913_v19 = vpop.f32.mrb[3].mxu0  ;;  %4143 = vtanh.f32 %v3032_v44 }
 0xe76   : > { %4145 = vtanh.f32 %v3035_v13 }
 0xe7e   : > { %v4144_v25 = vpop.eup %4143 }
 0xe80   : > { %v4146_v46 = vpop.eup %4145 }
 0xe81   : > { %v3040_v14 = vpack.c.bf16 %v4146_v46, %v4144_v25 }
 0xe83   : > { %3931 = vmatmul.mubr.bf16.vlgmr.msra.gmra.mrb[0].mxu1 %v3040_v14 }
 0xf56   : > { %v3146_v26 = vpop.f32.mrb[0].mxu1 }
 0xf57   : > { %v3147_v48 = vadd.f32 %v3575_v47, %v3146_v26  ;;  %v3932_v49 = vpop.f32.mrb[1].mxu1 }
 0xf58   : > { %v3149_v50 = vpop.f32.mrb[2].mxu1 }
 0xf59   : > { %3153 = vst [vmem:[%s4897_s27] sm:$0xff] %v3147_v48  ;;  %v3150_v51 = vadd.f32 %v3575_v47, %v3149_v50  ;;  %v3933_v52 = vpop.f32.mrb[3].mxu1 }
 0xf5b   : > { %3154 = vst [vmem:[%s4897_s27 + $0x8] sm:$0xff] %v3150_v51 }
 0xf5c PF: > { %s4898_s26 = sld [smem:[#allocation3_spill]] }
 0xf62   : > { %s34_s5 = sadd.s32 1, %s4898_s26  }
 0xf63   : > { %p31_p6 = scmp.ge.s32.totalorder %s34_s5, 4  }
 0xf65   :  { %33 = sbr.rel (!%p31_p6) target bundleno = 18 (0x12), region = 202 }

</bundles_post_ra>
